<compile_context>
chip_gen: v7x
topology: tpu7x:2x2x1
jax: 0.10.0
libtpu: 0.0.40
codegen_flags: <defaults>
</compile_context>

<pallas_src>
import functools
import numpy as np
import jax
import jax.numpy as jnp
from jax import lax
from jax.experimental import pallas as pl
from jax.experimental.pallas import tpu as pltpu

LN_EPS = 1e-5                    # torch.nn.LayerNorm default
_BF16 = jnp.bfloat16             # MXU input dtype (accumulation is always f32)

VMEM_LIMIT_BYTES = 64 * 1024 * 1024    # above 16/32 MiB scoped defaults; <= v7x physical
LAYER_VMEM_BUDGET = 40 * 1024 * 1024   # per-step activation budget (headroom on 64 MiB v7x)


def _layernorm(x, g, b):
    mu = jnp.mean(x, axis=-1, keepdims=True)
    var = jnp.mean((x - mu) ** 2, axis=-1, keepdims=True)
    return (x - mu) * lax.rsqrt(var + LN_EPS) * g + b


def _mm(a, w_bf16):
    """MXU matmul: bf16 inputs, f32 accumulation (weights pre-cast to bf16)."""
    return jnp.dot(a.astype(_BF16), w_bf16, preferred_element_type=jnp.float32)


# ---------------------------------------------------------------------------
# Fused transformer-layer kernel: fused-QKV multi-head attention + residual/LN
# + FFN + LN.  One grid step covers one batch tile; weight slabs are resident.
# ---------------------------------------------------------------------------
def _transformer_layer_kernel(num_heads, d_head,
                              x_ref, wqkv_ref, bqkv_ref, wo_ref, bo_ref,
                              g1_ref, be1_ref, w1_ref, b1_ref,
                              w2_ref, b2_ref, g2_ref, be2_ref,
                              out_ref, *rest):
    if len(rest) == 2:
        attn_ref, cat_ref = rest          # (attn output, concat scratch)
    else:
        attn_ref, (cat_ref,) = None, rest
    TB, S, D = x_ref.shape
    H, Dh = num_heads, d_head

    x2 = x_ref[...].reshape(TB * S, D)                        # (TB*S, D) f32

    # Fused Q/K/V projection for every head in one lane-dense MXU matmul.
    # The 1/sqrt(d_model) score scale is already folded into the Q columns/bias.
    qkv = _mm(x2, wqkv_ref[...]) + bqkv_ref[...]              # (TB*S, 3*H*Dh) f32

    # TODO(synk): optional attention `mask` path (this forward is called with mask=None).
    # TODO(synk): for long sequences a KV-block grid axis with flash-style online
    # softmax should replace the materialized SxS score/prob tensors.
    for h in range(H):       # static unroll; per-head state dies at the cat_ref store
        base = 3 * h * Dh    # packed columns: [head][q|k|v][Dh] -> contiguous per-head slice
        q = qkv[:, base:base + Dh].reshape(TB, S, Dh).astype(_BF16)
        k = qkv[:, base + Dh:base + 2 * Dh].reshape(TB, S, Dh).astype(_BF16)
        v = qkv[:, base + 2 * Dh:base + 3 * Dh].reshape(TB, S, Dh).astype(_BF16)

        # K consumed untransposed via a last-dim contraction (no XLU transpose).
        s = jnp.einsum('bqd,bkd->bqk', q, k, preferred_element_type=jnp.float32)
        s = s - jnp.max(s, axis=-1, keepdims=True)            # stable softmax, f32
        e = jnp.exp(s)
        a = e * pl.reciprocal(jnp.sum(e, axis=-1, keepdims=True), approx=True)
        if attn_ref is not None:
            attn_ref[:, h, :, :] = a                          # (TB, H, S, S) layout

        ho = jnp.einsum('bqk,bkd->bqd', a.astype(_BF16), v,
                        preferred_element_type=jnp.float32)   # (TB, S, Dh)
        # Drop this head's output at its static lane offset in the concat scratch.
        cat_ref[:, h * Dh:(h + 1) * Dh] = ho.reshape(TB * S, Dh).astype(_BF16)

    # concat(heads) @ WO as ONE wide (K = H*Dh) MXU matmul (no per-head small-K
    # matmuls, no accumulation passes).
    mha = _mm(cat_ref[...], wo_ref[...]) + bo_ref[...]        # (TB*S, D)

    r1 = _layernorm(x2 + mha, g1_ref[...], be1_ref[...])
    h1 = jnp.maximum(_mm(r1, w1_ref[...]) + b1_ref[...], 0.0)
    ff = _mm(h1, w2_ref[...]) + b2_ref[...]
    out_ref[...] = _layernorm(r1 + ff, g2_ref[...], be2_ref[...]).reshape(TB, S, D)


def _pick_layer_batch_tile(B, S, D, H, Dh, hidden, return_attn, lp,
                           budget=LAYER_VMEM_BUDGET):
    """Largest batch tile whose working set fits the VMEM budget, while keeping
    >= 2 (ideally 4) grid steps so pipelining / megacore sharding kick in."""
    per_row = (4 * S * D * 4                      # x in + out tiles, double-buffered
               + S * 3 * H * Dh * 4               # fused qkv
               + 3 * S * S * 4                    # s / e / a for one head
               + S * H * Dh * 2                   # bf16 concat scratch
               + S * (2 * D + hidden) * 4)        # r1, h1, ff
    if return_attn:
        per_row += 2 * H * S * S * 4              # attn writeback tile, double-buffered
    weight_bytes = 2 * sum(int(lp[k].size) * 2 for k in ("wqkv", "wo", "w1", "w2"))
    avail = max(budget - weight_bytes, per_row)
    tb = int(max(1, min(B, avail // per_row)))
    if B > 1:
        tb = max(1, min(tb, B // min(B, 4)))      # force a multi-step grid
    return tb


def run_transformer_layer(x, lp, return_attn=True, batch_tile=None):
    B, S, D = x.shape
    H, Dh = lp["num_heads"], lp["d_head"]
    hidden = lp["w1"].shape[1]

    if batch_tile is None:
        TB = _pick_layer_batch_tile(B, S, D, H, Dh, hidden, return_attn, lp)
    else:
        TB = max(1, min(batch_tile, B))
    grid = (pl.cdiv(B, TB),)

    weight_args = [lp["wqkv"], lp["bqkv"], lp["wo"], lp["bo"],
                   lp["g1"], lp["be1"], lp["w1"], lp["b1"],
                   lp["w2"], lp["b2"], lp["g2"], lp["be2"]]

    def full_spec(arr):
        nd = arr.ndim
        # Constant index map: slab fetched once, stays VMEM-resident across steps.
        return pl.BlockSpec(arr.shape, lambda b, _nd=nd: (0,) * _nd)

    in_specs = [pl.BlockSpec((TB, S, D), lambda b: (b, 0, 0))] + \
               [full_spec(a) for a in weight_args]

    kernel = functools.partial(_transformer_layer_kernel, H, Dh)

    if return_attn:
        out_shape = (jax.ShapeDtypeStruct((B, S, D), jnp.float32),
                     jax.ShapeDtypeStruct((B, H, S, S), jnp.float32))
        out_specs = (pl.BlockSpec((TB, S, D), lambda b: (b, 0, 0)),
                     pl.BlockSpec((TB, H, S, S), lambda b: (b, 0, 0, 0)))
    else:
        out_shape = jax.ShapeDtypeStruct((B, S, D), jnp.float32)
        out_specs = pl.BlockSpec((TB, S, D), lambda b: (b, 0, 0))

    result = pl.pallas_call(
        kernel,
        out_shape=out_shape,
        grid_spec=pltpu.PrefetchScalarGridSpec(
            num_scalar_prefetch=0, grid=grid,
            in_specs=in_specs, out_specs=out_specs,
            scratch_shapes=[pltpu.VMEM((TB * S, H * Dh), _BF16)]),
        compiler_params=pltpu.CompilerParams(
            dimension_semantics=("parallel",),      # batch tiles independent (v7x: 2 TCs)
            vmem_limit_bytes=VMEM_LIMIT_BYTES),
    )(x, *weight_args)
    if return_attn:
        return result[0], result[1]
    return result, None


# ---------------------------------------------------------------------------
# Classification head kernel: mean-pool over seq, linear to classes, log_softmax.
# ---------------------------------------------------------------------------
def classify_kernel(x_ref, w_ref, b_ref, out_ref):
    pooled = jnp.mean(x_ref[...], axis=1)                    # (TB, D) mean pooling, f32
    logits = jnp.dot(pooled.astype(_BF16), w_ref[...],
                     preferred_element_type=jnp.float32) + b_ref[...]
    z = logits - jnp.max(logits, axis=-1, keepdims=True)
    out_ref[...] = z - jnp.log(jnp.sum(jnp.exp(z), axis=-1, keepdims=True))  # log_softmax(dim=1)


def run_classifier(x, w_bf16, b, batch_tile=None):
    B, S, D = x.shape
    C = w_bf16.shape[-1]
    if batch_tile is None:
        per_row = 3 * S * D * 4
        TB = int(max(1, min(B, LAYER_VMEM_BUDGET // per_row)))
    else:
        TB = max(1, min(batch_tile, B))
    # (B, C) output block: if tiled, keep the sublane (batch) block a multiple of 8.
    if TB < B:
        TB = max(8, (TB // 8) * 8)
        if TB >= B:
            TB = B
    return pl.pallas_call(
        classify_kernel,
        out_shape=jax.ShapeDtypeStruct((B, C), jnp.float32),
        grid_spec=pltpu.PrefetchScalarGridSpec(
            num_scalar_prefetch=0, grid=(pl.cdiv(B, TB),),
            in_specs=[pl.BlockSpec((TB, S, D), lambda i: (i, 0, 0)),
                      pl.BlockSpec((D, C), lambda i: (0, 0)),
                      pl.BlockSpec((1, C), lambda i: (0, 0))],
            out_specs=pl.BlockSpec((TB, C), lambda i: (i, 0))),
        compiler_params=pltpu.CompilerParams(
            dimension_semantics=("parallel",),
            vmem_limit_bytes=VMEM_LIMIT_BYTES),
    )(x, w_bf16, b)


# ---------------------------------------------------------------------------
# Full forward pass (embedding lookup / positional add stay in plain JAX glue).
# ---------------------------------------------------------------------------
def transformer_encoder_forward(indices, params, return_attn_maps=True):
    S = indices.shape[1]
    x = params["emb"][indices]                    # embedding lookup (glue)
    x = x + params["pos"][:S][None]               # learned positional encoding, batched
    attention_maps = []                           # one (B, H, S, S) slab per layer
    for lp in params["packed_layers"]:
        x, attn = run_transformer_layer(x, lp, return_attn=return_attn_maps)
        if return_attn_maps:
            # Whole (B, H, S, S) slab per layer (attention_maps[l][:, h] matches the
            # PyTorch per-head map l*H + h); avoids H HBM-re-reading slice ops.
            attention_maps.append(attn)
    logprobs = run_classifier(x, params["wc_bf16"], params["bc"])
    return logprobs, attention_maps


# ---------------------------------------------------------------------------
# Parameter init (torch-like per-head f32 params) + packing into fused bf16
# weight slabs consumed by the kernels.
# ---------------------------------------------------------------------------
def pack_layer(lp):
    """Pack per-head Q/K/V into one (D, H*3*Dh) slab (1/sqrt(D) folded into Q)
    and keep WO flat (H*Dh, D); matmul weights are pre-cast to bf16."""
    H, D, Dh = lp["wq"].shape
    assert Dh == D, "module only type-checks when d_internal == d_model"
    scale = 1.0 / (D ** 0.5)                      # torch divides scores by WQ.in_features**0.5

    w_head = jnp.concatenate([lp["wq"] * scale, lp["wk"], lp["wv"]], axis=-1)  # (H, D, 3*Dh)
    b_head = jnp.concatenate([lp["bq"] * scale, lp["bk"], lp["bv"]], axis=-1)  # (H, 1, 3*Dh)
    wqkv = jnp.transpose(w_head, (1, 0, 2)).reshape(D, H * 3 * Dh)   # cols: [head][q|k|v][Dh]
    bqkv = jnp.transpose(b_head, (1, 0, 2)).reshape(1, H * 3 * Dh)

    return {
        "num_heads": H, "d_head": Dh,
        "wqkv": wqkv.astype(_BF16),               # (D, 3*H*Dh) bf16, Q pre-scaled
        "bqkv": bqkv,                             # (1, 3*H*Dh) f32, Q bias pre-scaled
        "wo": lp["wo"].astype(_BF16),             # (H*Dh, D)  bf16, head-major rows
        "bo": lp["bo"],
        "g1": lp["g1"], "be1": lp["be1"],
        "w1": lp["w1"].astype(_BF16), "b1": lp["b1"],
        "w2": lp["w2"].astype(_BF16), "b2": lp["b2"],
        "g2": lp["g2"], "be2": lp["be2"],
    }


def init_params(key, vocab_size, num_positions, d_model, d_internal, num_classes,
                num_layers, num_heads, hidden_size):
    assert d_internal == d_model, "module only works when d_internal == d_model"
    keys = jax.random.split(key, 4 + num_layers)

    def dense(k, shape, scale=0.1):
        return jax.random.normal(k, shape, jnp.float32) * scale

    params = {
        "emb": jax.random.normal(keys[0], (vocab_size, d_model), jnp.float32),
        "pos": jax.random.normal(keys[1], (num_positions, d_model), jnp.float32) * 0.1,
        "wc": dense(keys[2], (d_model, num_classes)),
        "bc": dense(keys[3], (1, num_classes)),
        "layers": [],
    }
    for li in range(num_layers):
        lk = jax.random.split(keys[4 + li], 12)
        params["layers"].append({
            "wq": dense(lk[0], (num_heads, d_model, d_internal)),
            "bq": dense(lk[1], (num_heads, 1, d_internal)),
            "wk": dense(lk[2], (num_heads, d_model, d_internal)),
            "bk": dense(lk[3], (num_heads, 1, d_internal)),
            "wv": dense(lk[4], (num_heads, d_model, d_model)),
            "bv": dense(lk[5], (num_heads, 1, d_model)),
            "wo": dense(lk[6], (num_heads * d_internal, d_model)),
            "bo": dense(lk[7], (1, d_model)),
            "g1": jnp.ones((1, d_model), jnp.float32),
            "be1": jnp.zeros((1, d_model), jnp.float32),
            "w1": dense(lk[8], (d_model, hidden_size)),
            "b1": dense(lk[9], (1, hidden_size)),
            "w2": dense(lk[10], (hidden_size, d_model)),
            "b2": dense(lk[11], (1, d_model)),
            "g2": jnp.ones((1, d_model), jnp.float32),
            "be2": jnp.zeros((1, d_model), jnp.float32),
        })
    params["packed_layers"] = [pack_layer(lp) for lp in params["layers"]]
    params["wc_bf16"] = params["wc"].astype(_BF16)
    return params


# Pure-JAX f32 reference mirroring the PyTorch forward, for correctness checking.
def reference_forward(indices, params):
    x = params["emb"][indices] + params["pos"][:indices.shape[1]][None]
    for lp in params["layers"]:
        H = lp["wq"].shape[0]
        D = x.shape[-1]
        heads = []
        for h in range(H):
            q = x @ lp["wq"][h] + lp["bq"][h]
            k = x @ lp["wk"][h] + lp["bk"][h]
            v = x @ lp["wv"][h] + lp["bv"][h]
            qk = (q @ jnp.swapaxes(k, -1, -2)) / (D ** 0.5)
            a = jax.nn.softmax(qk, axis=-1)
            heads.append(a @ v)
        mha = jnp.concatenate(heads, axis=-1) @ lp["wo"] + lp["bo"]
        r1 = _layernorm(x + mha, lp["g1"], lp["be1"])
        ff = jnp.maximum(r1 @ lp["w1"] + lp["b1"], 0.0) @ lp["w2"] + lp["b2"]
        x = _layernorm(r1 + ff, lp["g2"], lp["be2"])
    pooled = jnp.mean(x, axis=1)
    logits = pooled @ params["wc"] + params["bc"]
    return jax.nn.log_softmax(logits, axis=1)


if __name__ == "__main__":
    vocab_size = 50
    num_positions = 16
    d_model = 32
    d_internal = 32
    num_classes = 4
    num_layers = 2
    num_heads = 2
    hidden_size = 64
    B, S = 2, 8

    key = jax.random.PRNGKey(0)
    pkey, ikey = jax.random.split(key)
    params = init_params(pkey, vocab_size, num_positions, d_model, d_internal,
                         num_classes, num_layers, num_heads, hidden_size)
    indices = jax.random.randint(ikey, (B, S), 0, vocab_size, dtype=jnp.int32)

    logprobs, attn_maps = transformer_encoder_forward(indices, params)
    logprobs = jax.block_until_ready(logprobs)

    # Hot path without the attention-map dump (same math, no attn stores).
    logprobs_noattn, _ = transformer_encoder_forward(indices, params, return_attn_maps=False)
    logprobs_noattn = jax.block_until_ready(logprobs_noattn)

    ref = reference_forward(indices, params)
    # Tolerance accounts for bf16 matmul inputs (f32 accumulation) + approx reciprocal.
    np.testing.assert_allclose(np.asarray(logprobs), np.asarray(ref), rtol=5e-2, atol=5e-2)
    np.testing.assert_allclose(np.asarray(logprobs_noattn), np.asarray(logprobs),
                               rtol=1e-5, atol=1e-5)
    assert logprobs.shape == (B, num_classes)
    assert len(attn_maps) == num_layers
    assert attn_maps[0].shape == (B, num_heads, S, S)
    row_sums = jnp.sum(attn_maps[0], axis=-1)
    assert bool(jnp.all(jnp.abs(row_sums - 1.0) < 1e-2))     # softmax rows ~ 1 (approx recip)
    assert bool(jnp.all(jnp.isfinite(logprobs)))

    print("KERNEL_OK")
</pallas_src>

<mosaic_0001>
module attributes {stable_mosaic.version = 11 : i64} {
  func.func @_transformer_layer_kernel(%arg0: i32, %arg1: memref<1x8x32xf32, #tpu.memory_space<vmem>>, %arg2: memref<32x192xbf16, #tpu.memory_space<vmem>>, %arg3: memref<1x192xf32, #tpu.memory_space<vmem>>, %arg4: memref<64x32xbf16, #tpu.memory_space<vmem>>, %arg5: memref<1x32xf32, #tpu.memory_space<vmem>>, %arg6: memref<1x32xf32, #tpu.memory_space<vmem>>, %arg7: memref<1x32xf32, #tpu.memory_space<vmem>>, %arg8: memref<32x64xbf16, #tpu.memory_space<vmem>>, %arg9: memref<1x64xf32, #tpu.memory_space<vmem>>, %arg10: memref<64x32xbf16, #tpu.memory_space<vmem>>, %arg11: memref<1x32xf32, #tpu.memory_space<vmem>>, %arg12: memref<1x32xf32, #tpu.memory_space<vmem>>, %arg13: memref<1x32xf32, #tpu.memory_space<vmem>>, %arg14: memref<1x8x32xf32, #tpu.memory_space<vmem>>, %arg15: memref<1x2x8x8xf32, #tpu.memory_space<vmem>>, %arg16: memref<8x64xbf16, #tpu.memory_space<vmem>>) attributes {dimension_semantics = [#tpu.dimension_semantics<parallel>], iteration_bounds = array<i64: 2>, scalar_prefetch = 0 : i64, scratch_operands = 1 : i64, tpu.core_type = #tpu.core_type<tc>, window_params = [{transform_indices = @transform_0, window_bounds = array<i64: 1, 8, 32>}, {pipeline_mode = #tpu.pipeline_mode<synchronous>, transform_indices = @transform_1, window_bounds = array<i64: 32, 192>}, {pipeline_mode = #tpu.pipeline_mode<synchronous>, transform_indices = @transform_2, window_bounds = array<i64: 1, 192>}, {pipeline_mode = #tpu.pipeline_mode<synchronous>, transform_indices = @transform_3, window_bounds = array<i64: 64, 32>}, {pipeline_mode = #tpu.pipeline_mode<synchronous>, transform_indices = @transform_4, window_bounds = array<i64: 1, 32>}, {pipeline_mode = #tpu.pipeline_mode<synchronous>, transform_indices = @transform_5, window_bounds = array<i64: 1, 32>}, {pipeline_mode = #tpu.pipeline_mode<synchronous>, transform_indices = @transform_6, window_bounds = array<i64: 1, 32>}, {pipeline_mode = #tpu.pipeline_mode<synchronous>, transform_indices = @transform_7, window_bounds = array<i64: 32, 64>}, {pipeline_mode = #tpu.pipeline_mode<synchronous>, transform_indices = @transform_8, window_bounds = array<i64: 1, 64>}, {pipeline_mode = #tpu.pipeline_mode<synchronous>, transform_indices = @transform_9, window_bounds = array<i64: 64, 32>}, {pipeline_mode = #tpu.pipeline_mode<synchronous>, transform_indices = @transform_10, window_bounds = array<i64: 1, 32>}, {pipeline_mode = #tpu.pipeline_mode<synchronous>, transform_indices = @transform_11, window_bounds = array<i64: 1, 32>}, {pipeline_mode = #tpu.pipeline_mode<synchronous>, transform_indices = @transform_12, window_bounds = array<i64: 1, 32>}, {transform_indices = @transform_13, window_bounds = array<i64: 1, 8, 32>}, {transform_indices = @transform_14, window_bounds = array<i64: 1, 2, 8, 8>}]} {
    %c0 = arith.constant 0 : index
    %c0_0 = arith.constant 0 : index
    %c0_1 = arith.constant 0 : index
    %0 = vector.load %arg1[%c0, %c0_0, %c0_1] : memref<1x8x32xf32, #tpu.memory_space<vmem>>, vector<1x8x32xf32>
    %1 = vector.shape_cast %0 : vector<1x8x32xf32> to vector<8x32xf32>
    %c0_2 = arith.constant 0 : index
    %c0_3 = arith.constant 0 : index
    %2 = vector.load %arg2[%c0_2, %c0_3] : memref<32x192xbf16, #tpu.memory_space<vmem>>, vector<32x192xbf16>
    %3 = arith.truncf %1 : vector<8x32xf32> to vector<8x32xbf16>
    %cst = arith.constant dense<0.000000e+00> : vector<8x192xf32>
    %4 = tpu.matmul %3, %2, %cst {dimension_numbers = #tpu.dot_dimension_numbers<[1], [0], [0], [1], [0, 0, 1, 1], [], []>} : vector<8x32xbf16>, vector<32x192xbf16>, vector<8x192xf32> -> vector<8x192xf32>
    %c0_4 = arith.constant 0 : index
    %c0_5 = arith.constant 0 : index
    %5 = vector.load %arg3[%c0_4, %c0_5] : memref<1x192xf32, #tpu.memory_space<vmem>>, vector<1x192xf32>
    %6 = vector.broadcast %5 : vector<1x192xf32> to vector<8x192xf32>
    %7 = arith.addf %4, %6 : vector<8x192xf32>
    %8 = vector.extract_strided_slice %7 {offsets = [0, 0], sizes = [8, 32], strides = [1, 1]} : vector<8x192xf32> to vector<8x32xf32>
    %9 = vector.shape_cast %8 : vector<8x32xf32> to vector<1x8x32xf32>
    %10 = arith.truncf %9 : vector<1x8x32xf32> to vector<1x8x32xbf16>
    %11 = vector.extract_strided_slice %7 {offsets = [0, 32], sizes = [8, 32], strides = [1, 1]} : vector<8x192xf32> to vector<8x32xf32>
    %12 = vector.shape_cast %11 : vector<8x32xf32> to vector<1x8x32xf32>
    %13 = arith.truncf %12 : vector<1x8x32xf32> to vector<1x8x32xbf16>
    %14 = vector.extract_strided_slice %7 {offsets = [0, 64], sizes = [8, 32], strides = [1, 1]} : vector<8x192xf32> to vector<8x32xf32>
    %15 = vector.shape_cast %14 : vector<8x32xf32> to vector<1x8x32xf32>
    %16 = arith.truncf %15 : vector<1x8x32xf32> to vector<1x8x32xbf16>
    "tpu.trace_start"() <{level = 10 : i32, message = "bqd,bkd->bqk"}> : () -> ()
    %cst_6 = arith.constant dense<0.000000e+00> : vector<1x8x8xf32>
    %17 = tpu.matmul %10, %13, %cst_6 {dimension_numbers = #tpu.dot_dimension_numbers<[2], [2], [1], [1], [0, 0, 0, 1, 1, 1], [0], [0]>} : vector<1x8x32xbf16>, vector<1x8x32xbf16>, vector<1x8x8xf32> -> vector<1x8x8xf32>
    "tpu.trace_stop"() : () -> ()
    %cst_7 = arith.constant dense<0xFF800000> : vector<1x8xf32>
    %18 = vector.multi_reduction <maximumf>, %17, %cst_7 [2] : vector<1x8x8xf32> to vector<1x8xf32>
    %19 = vector.shape_cast %18 : vector<1x8xf32> to vector<1x8x1xf32>
    %20 = vector.broadcast %19 : vector<1x8x1xf32> to vector<1x8x8xf32>
    %21 = arith.subf %17, %20 : vector<1x8x8xf32>
    %22 = math.exp %21 : vector<1x8x8xf32>
    %cst_8 = arith.constant dense<0.000000e+00> : vector<1x8xf32>
    %23 = vector.multi_reduction <add>, %22, %cst_8 [2] : vector<1x8x8xf32> to vector<1x8xf32>
    %24 = vector.shape_cast %23 : vector<1x8xf32> to vector<1x8x1xf32>
    %25 = tpu.reciprocal %24 {approx = true} : vector<1x8x1xf32> -> vector<1x8x1xf32>
    %26 = vector.broadcast %25 : vector<1x8x1xf32> to vector<1x8x8xf32>
    %27 = arith.mulf %22, %26 : vector<1x8x8xf32>
    %c0_9 = arith.constant 0 : index
    %c0_10 = arith.constant 0 : index
    %c0_11 = arith.constant 0 : index
    %c0_12 = arith.constant 0 : index
    %28 = vector.load %arg15[%c0_9, %c0_10, %c0_11, %c0_12] : memref<1x2x8x8xf32, #tpu.memory_space<vmem>>, vector<1x1x8x8xf32>
    %29 = vector.shape_cast %28 : vector<1x1x8x8xf32> to vector<1x8x8xf32>
    %30 = vector.shape_cast %27 : vector<1x8x8xf32> to vector<1x1x8x8xf32>
    tpu.vector_store %arg15[%c0_9, %c0_10, %c0_11, %c0_12], %30 {strides = array<i32>} : memref<1x2x8x8xf32, #tpu.memory_space<vmem>>, vector<1x1x8x8xf32>,
    %31 = arith.truncf %27 : vector<1x8x8xf32> to vector<1x8x8xbf16>
    "tpu.trace_start"() <{level = 10 : i32, message = "bqk,bkd->bqd"}> : () -> ()
    %cst_13 = arith.constant dense<0.000000e+00> : vector<1x8x32xf32>
    %32 = tpu.matmul %31, %16, %cst_13 {dimension_numbers = #tpu.dot_dimension_numbers<[2], [1], [1], [2], [0, 0, 0, 1, 1, 2], [0], [0]>} : vector<1x8x8xbf16>, vector<1x8x32xbf16>, vector<1x8x32xf32> -> vector<1x8x32xf32>
    "tpu.trace_stop"() : () -> ()
    %33 = vector.shape_cast %32 : vector<1x8x32xf32> to vector<8x32xf32>
    %34 = arith.truncf %33 : vector<8x32xf32> to vector<8x32xbf16>
    %c0_14 = arith.constant 0 : index
    %c0_15 = arith.constant 0 : index
    %35 = vector.load %arg16[%c0_14, %c0_15] : memref<8x64xbf16, #tpu.memory_space<vmem>>, vector<8x32xbf16>
    tpu.vector_store %arg16[%c0_14, %c0_15], %34 {strides = array<i32>} : memref<8x64xbf16, #tpu.memory_space<vmem>>, vector<8x32xbf16>,
    %36 = vector.extract_strided_slice %7 {offsets = [0, 96], sizes = [8, 32], strides = [1, 1]} : vector<8x192xf32> to vector<8x32xf32>
    %37 = vector.shape_cast %36 : vector<8x32xf32> to vector<1x8x32xf32>
    %38 = arith.truncf %37 : vector<1x8x32xf32> to vector<1x8x32xbf16>
    %39 = vector.extract_strided_slice %7 {offsets = [0, 128], sizes = [8, 32], strides = [1, 1]} : vector<8x192xf32> to vector<8x32xf32>
    %40 = vector.shape_cast %39 : vector<8x32xf32> to vector<1x8x32xf32>
    %41 = arith.truncf %40 : vector<1x8x32xf32> to vector<1x8x32xbf16>
    %42 = vector.extract_strided_slice %7 {offsets = [0, 160], sizes = [8, 32], strides = [1, 1]} : vector<8x192xf32> to vector<8x32xf32>
    %43 = vector.shape_cast %42 : vector<8x32xf32> to vector<1x8x32xf32>
    %44 = arith.truncf %43 : vector<1x8x32xf32> to vector<1x8x32xbf16>
    "tpu.trace_start"() <{level = 10 : i32, message = "bqd,bkd->bqk"}> : () -> ()
    %cst_16 = arith.constant dense<0.000000e+00> : vector<1x8x8xf32>
    %45 = tpu.matmul %38, %41, %cst_16 {dimension_numbers = #tpu.dot_dimension_numbers<[2], [2], [1], [1], [0, 0, 0, 1, 1, 1], [0], [0]>} : vector<1x8x32xbf16>, vector<1x8x32xbf16>, vector<1x8x8xf32> -> vector<1x8x8xf32>
    "tpu.trace_stop"() : () -> ()
    %cst_17 = arith.constant dense<0xFF800000> : vector<1x8xf32>
    %46 = vector.multi_reduction <maximumf>, %45, %cst_17 [2] : vector<1x8x8xf32> to vector<1x8xf32>
    %47 = vector.shape_cast %46 : vector<1x8xf32> to vector<1x8x1xf32>
    %48 = vector.broadcast %47 : vector<1x8x1xf32> to vector<1x8x8xf32>
    %49 = arith.subf %45, %48 : vector<1x8x8xf32>
    %50 = math.exp %49 : vector<1x8x8xf32>
    %cst_18 = arith.constant dense<0.000000e+00> : vector<1x8xf32>
    %51 = vector.multi_reduction <add>, %50, %cst_18 [2] : vector<1x8x8xf32> to vector<1x8xf32>
    %52 = vector.shape_cast %51 : vector<1x8xf32> to vector<1x8x1xf32>
    %53 = tpu.reciprocal %52 {approx = true} : vector<1x8x1xf32> -> vector<1x8x1xf32>
    %54 = vector.broadcast %53 : vector<1x8x1xf32> to vector<1x8x8xf32>
    %55 = arith.mulf %50, %54 : vector<1x8x8xf32>
    %c0_19 = arith.constant 0 : index
    %c1 = arith.constant 1 : index
    %c0_20 = arith.constant 0 : index
    %c0_21 = arith.constant 0 : index
    %56 = vector.load %arg15[%c0_19, %c1, %c0_20, %c0_21] : memref<1x2x8x8xf32, #tpu.memory_space<vmem>>, vector<1x1x8x8xf32>
    %57 = vector.shape_cast %56 : vector<1x1x8x8xf32> to vector<1x8x8xf32>
    %58 = vector.shape_cast %55 : vector<1x8x8xf32> to vector<1x1x8x8xf32>
    tpu.vector_store %arg15[%c0_19, %c1, %c0_20, %c0_21], %58 {strides = array<i32>} : memref<1x2x8x8xf32, #tpu.memory_space<vmem>>, vector<1x1x8x8xf32>,
    %59 = arith.truncf %55 : vector<1x8x8xf32> to vector<1x8x8xbf16>
    "tpu.trace_start"() <{level = 10 : i32, message = "bqk,bkd->bqd"}> : () -> ()
    %cst_22 = arith.constant dense<0.000000e+00> : vector<1x8x32xf32>
    %60 = tpu.matmul %59, %44, %cst_22 {dimension_numbers = #tpu.dot_dimension_numbers<[2], [1], [1], [2], [0, 0, 0, 1, 1, 2], [0], [0]>} : vector<1x8x8xbf16>, vector<1x8x32xbf16>, vector<1x8x32xf32> -> vector<1x8x32xf32>
    "tpu.trace_stop"() : () -> ()
    %61 = vector.shape_cast %60 : vector<1x8x32xf32> to vector<8x32xf32>
    %62 = arith.truncf %61 : vector<8x32xf32> to vector<8x32xbf16>
    %c0_23 = arith.constant 0 : index
    %c32 = arith.constant 32 : index
    %63 = vector.load %arg16[%c0_23, %c32] : memref<8x64xbf16, #tpu.memory_space<vmem>>, vector<8x32xbf16>
    tpu.vector_store %arg16[%c0_23, %c32], %62 {strides = array<i32>} : memref<8x64xbf16, #tpu.memory_space<vmem>>, vector<8x32xbf16>,
    %c0_24 = arith.constant 0 : index
    %c0_25 = arith.constant 0 : index
    %64 = vector.load %arg16[%c0_24, %c0_25] : memref<8x64xbf16, #tpu.memory_space<vmem>>, vector<8x64xbf16>
    %c0_26 = arith.constant 0 : index
    %c0_27 = arith.constant 0 : index
    %65 = vector.load %arg4[%c0_26, %c0_27] : memref<64x32xbf16, #tpu.memory_space<vmem>>, vector<64x32xbf16>
    %cst_28 = arith.constant dense<0.000000e+00> : vector<8x32xf32>
    %66 = tpu.matmul %64, %65, %cst_28 {dimension_numbers = #tpu.dot_dimension_numbers<[1], [0], [0], [1], [0, 0, 1, 1], [], []>} : vector<8x64xbf16>, vector<64x32xbf16>, vector<8x32xf32> -> vector<8x32xf32>
    %c0_29 = arith.constant 0 : index
    %c0_30 = arith.constant 0 : index
    %67 = vector.load %arg5[%c0_29, %c0_30] : memref<1x32xf32, #tpu.memory_space<vmem>>, vector<1x32xf32>
    %68 = vector.broadcast %67 : vector<1x32xf32> to vector<8x32xf32>
    %69 = arith.addf %66, %68 : vector<8x32xf32>
    %70 = arith.addf %1, %69 : vector<8x32xf32>
    %c0_31 = arith.constant 0 : index
    %c0_32 = arith.constant 0 : index
    %71 = vector.load %arg6[%c0_31, %c0_32] : memref<1x32xf32, #tpu.memory_space<vmem>>, vector<1x32xf32>
    %c0_33 = arith.constant 0 : index
    %c0_34 = arith.constant 0 : index
    %72 = vector.load %arg7[%c0_33, %c0_34] : memref<1x32xf32, #tpu.memory_space<vmem>>, vector<1x32xf32>
    %cst_35 = arith.constant dense<0.000000e+00> : vector<8xf32>
    %73 = vector.multi_reduction <add>, %70, %cst_35 [1] : vector<8x32xf32> to vector<8xf32>
    %74 = vector.shape_cast %73 : vector<8xf32> to vector<8x1xf32>
    %cst_36 = arith.constant 3.200000e+01 : f32
    %75 = vector.broadcast %cst_36 : f32 to vector<8x1xf32>
    %76 = arith.divf %74, %75 : vector<8x1xf32>
    %77 = vector.broadcast %76 : vector<8x1xf32> to vector<8x32xf32>
    %78 = arith.subf %70, %77 : vector<8x32xf32>
    %79 = arith.mulf %78, %78 : vector<8x32xf32>
    %cst_37 = arith.constant dense<0.000000e+00> : vector<8xf32>
    %80 = vector.multi_reduction <add>, %79, %cst_37 [1] : vector<8x32xf32> to vector<8xf32>
    %81 = vector.shape_cast %80 : vector<8xf32> to vector<8x1xf32>
    %cst_38 = arith.constant 3.200000e+01 : f32
    %82 = vector.broadcast %cst_38 : f32 to vector<8x1xf32>
    %83 = arith.divf %81, %82 : vector<8x1xf32>
    %84 = vector.broadcast %76 : vector<8x1xf32> to vector<8x32xf32>
    %85 = arith.subf %70, %84 : vector<8x32xf32>
    %cst_39 = arith.constant 9.99999974E-6 : f32
    %86 = vector.broadcast %cst_39 : f32 to vector<8x1xf32>
    %87 = arith.addf %83, %86 : vector<8x1xf32>
    %88 = math.rsqrt %87 : vector<8x1xf32>
    %89 = vector.broadcast %88 : vector<8x1xf32> to vector<8x32xf32>
    %90 = arith.mulf %85, %89 : vector<8x32xf32>
    %91 = vector.broadcast %71 : vector<1x32xf32> to vector<8x32xf32>
    %92 = arith.mulf %90, %91 : vector<8x32xf32>
    %93 = vector.broadcast %72 : vector<1x32xf32> to vector<8x32xf32>
    %94 = arith.addf %92, %93 : vector<8x32xf32>
    %c0_40 = arith.constant 0 : index
    %c0_41 = arith.constant 0 : index
    %95 = vector.load %arg8[%c0_40, %c0_41] : memref<32x64xbf16, #tpu.memory_space<vmem>>, vector<32x64xbf16>
    %96 = arith.truncf %94 : vector<8x32xf32> to vector<8x32xbf16>
    %cst_42 = arith.constant dense<0.000000e+00> : vector<8x64xf32>
    %97 = tpu.matmul %96, %95, %cst_42 {dimension_numbers = #tpu.dot_dimension_numbers<[1], [0], [0], [1], [0, 0, 1, 1], [], []>} : vector<8x32xbf16>, vector<32x64xbf16>, vector<8x64xf32> -> vector<8x64xf32>
    %c0_43 = arith.constant 0 : index
    %c0_44 = arith.constant 0 : index
    %98 = vector.load %arg9[%c0_43, %c0_44] : memref<1x64xf32, #tpu.memory_space<vmem>>, vector<1x64xf32>
    %99 = vector.broadcast %98 : vector<1x64xf32> to vector<8x64xf32>
    %100 = arith.addf %97, %99 : vector<8x64xf32>
    %cst_45 = arith.constant 0.000000e+00 : f32
    %101 = vector.broadcast %cst_45 : f32 to vector<8x64xf32>
    %102 = arith.maximumf %100, %101 : vector<8x64xf32>
    %c0_46 = arith.constant 0 : index
    %c0_47 = arith.constant 0 : index
    %103 = vector.load %arg10[%c0_46, %c0_47] : memref<64x32xbf16, #tpu.memory_space<vmem>>, vector<64x32xbf16>
    %104 = arith.truncf %102 : vector<8x64xf32> to vector<8x64xbf16>
    %cst_48 = arith.constant dense<0.000000e+00> : vector<8x32xf32>
    %105 = tpu.matmul %104, %103, %cst_48 {dimension_numbers = #tpu.dot_dimension_numbers<[1], [0], [0], [1], [0, 0, 1, 1], [], []>} : vector<8x64xbf16>, vector<64x32xbf16>, vector<8x32xf32> -> vector<8x32xf32>
    %c0_49 = arith.constant 0 : index
    %c0_50 = arith.constant 0 : index
    %106 = vector.load %arg11[%c0_49, %c0_50] : memref<1x32xf32, #tpu.memory_space<vmem>>, vector<1x32xf32>
    %107 = vector.broadcast %106 : vector<1x32xf32> to vector<8x32xf32>
    %108 = arith.addf %105, %107 : vector<8x32xf32>
    %109 = arith.addf %94, %108 : vector<8x32xf32>
    %c0_51 = arith.constant 0 : index
    %c0_52 = arith.constant 0 : index
    %110 = vector.load %arg12[%c0_51, %c0_52] : memref<1x32xf32, #tpu.memory_space<vmem>>, vector<1x32xf32>
    %c0_53 = arith.constant 0 : index
    %c0_54 = arith.constant 0 : index
    %111 = vector.load %arg13[%c0_53, %c0_54] : memref<1x32xf32, #tpu.memory_space<vmem>>, vector<1x32xf32>
    %cst_55 = arith.constant dense<0.000000e+00> : vector<8xf32>
    %112 = vector.multi_reduction <add>, %109, %cst_55 [1] : vector<8x32xf32> to vector<8xf32>
    %113 = vector.shape_cast %112 : vector<8xf32> to vector<8x1xf32>
    %cst_56 = arith.constant 3.200000e+01 : f32
    %114 = vector.broadcast %cst_56 : f32 to vector<8x1xf32>
    %115 = arith.divf %113, %114 : vector<8x1xf32>
    %116 = vector.broadcast %115 : vector<8x1xf32> to vector<8x32xf32>
    %117 = arith.subf %109, %116 : vector<8x32xf32>
    %118 = arith.mulf %117, %117 : vector<8x32xf32>
    %cst_57 = arith.constant dense<0.000000e+00> : vector<8xf32>
    %119 = vector.multi_reduction <add>, %118, %cst_57 [1] : vector<8x32xf32> to vector<8xf32>
    %120 = vector.shape_cast %119 : vector<8xf32> to vector<8x1xf32>
    %cst_58 = arith.constant 3.200000e+01 : f32
    %121 = vector.broadcast %cst_58 : f32 to vector<8x1xf32>
    %122 = arith.divf %120, %121 : vector<8x1xf32>
    %123 = vector.broadcast %115 : vector<8x1xf32> to vector<8x32xf32>
    %124 = arith.subf %109, %123 : vector<8x32xf32>
    %cst_59 = arith.constant 9.99999974E-6 : f32
    %125 = vector.broadcast %cst_59 : f32 to vector<8x1xf32>
    %126 = arith.addf %122, %125 : vector<8x1xf32>
    %127 = math.rsqrt %126 : vector<8x1xf32>
    %128 = vector.broadcast %127 : vector<8x1xf32> to vector<8x32xf32>
    %129 = arith.mulf %124, %128 : vector<8x32xf32>
    %130 = vector.broadcast %110 : vector<1x32xf32> to vector<8x32xf32>
    %131 = arith.mulf %129, %130 : vector<8x32xf32>
    %132 = vector.broadcast %111 : vector<1x32xf32> to vector<8x32xf32>
    %133 = arith.addf %131, %132 : vector<8x32xf32>
    %134 = vector.shape_cast %133 : vector<8x32xf32> to vector<1x8x32xf32>
    %c0_60 = arith.constant 0 : index
    %c0_61 = arith.constant 0 : index
    %c0_62 = arith.constant 0 : index
    %135 = vector.load %arg14[%c0_60, %c0_61, %c0_62] : memref<1x8x32xf32, #tpu.memory_space<vmem>>, vector<1x8x32xf32>
    tpu.vector_store %arg14[%c0_60, %c0_61, %c0_62], %134 {strides = array<i32>} : memref<1x8x32xf32, #tpu.memory_space<vmem>>, vector<1x8x32xf32>,
    return
  }
  func.func @transform_0(%arg0: i32) -> (i32, i32, i32) {
    %c0_i32 = arith.constant 0 : i32
    %c0_i32_0 = arith.constant 0 : i32
    %c0_i32_1 = arith.constant 0 : i32
    return %arg0, %c0_i32, %c0_i32_0 : i32, i32, i32
  }
  func.func @transform_1(%arg0: i32) -> (i32, i32) {
    %c0_i32 = arith.constant 0 : i32
    %c0_i32_0 = arith.constant 0 : i32
    %c0_i32_1 = arith.constant 0 : i32
    return %c0_i32, %c0_i32_0 : i32, i32
  }
  func.func @transform_2(%arg0: i32) -> (i32, i32) {
    %c0_i32 = arith.constant 0 : i32
    %c0_i32_0 = arith.constant 0 : i32
    %c0_i32_1 = arith.constant 0 : i32
    return %c0_i32, %c0_i32_0 : i32, i32
  }
  func.func @transform_3(%arg0: i32) -> (i32, i32) {
    %c0_i32 = arith.constant 0 : i32
    %c0_i32_0 = arith.constant 0 : i32
    %c0_i32_1 = arith.constant 0 : i32
    return %c0_i32, %c0_i32_0 : i32, i32
  }
  func.func @transform_4(%arg0: i32) -> (i32, i32) {
    %c0_i32 = arith.constant 0 : i32
    %c0_i32_0 = arith.constant 0 : i32
    %c0_i32_1 = arith.constant 0 : i32
    return %c0_i32, %c0_i32_0 : i32, i32
  }
  func.func @transform_5(%arg0: i32) -> (i32, i32) {
    %c0_i32 = arith.constant 0 : i32
    %c0_i32_0 = arith.constant 0 : i32
    %c0_i32_1 = arith.constant 0 : i32
    return %c0_i32, %c0_i32_0 : i32, i32
  }
  func.func @transform_6(%arg0: i32) -> (i32, i32) {
    %c0_i32 = arith.constant 0 : i32
    %c0_i32_0 = arith.constant 0 : i32
    %c0_i32_1 = arith.constant 0 : i32
    return %c0_i32, %c0_i32_0 : i32, i32
  }
  func.func @transform_7(%arg0: i32) -> (i32, i32) {
    %c0_i32 = arith.constant 0 : i32
    %c0_i32_0 = arith.constant 0 : i32
    %c0_i32_1 = arith.constant 0 : i32
    return %c0_i32, %c0_i32_0 : i32, i32
  }
  func.func @transform_8(%arg0: i32) -> (i32, i32) {
    %c0_i32 = arith.constant 0 : i32
    %c0_i32_0 = arith.constant 0 : i32
    %c0_i32_1 = arith.constant 0 : i32
    return %c0_i32, %c0_i32_0 : i32, i32
  }
  func.func @transform_9(%arg0: i32) -> (i32, i32) {
    %c0_i32 = arith.constant 0 : i32
    %c0_i32_0 = arith.constant 0 : i32
    %c0_i32_1 = arith.constant 0 : i32
    return %c0_i32, %c0_i32_0 : i32, i32
  }
  func.func @transform_10(%arg0: i32) -> (i32, i32) {
    %c0_i32 = arith.constant 0 : i32
    %c0_i32_0 = arith.constant 0 : i32
    %c0_i32_1 = arith.constant 0 : i32
    return %c0_i32, %c0_i32_0 : i32, i32
  }
  func.func @transform_11(%arg0: i32) -> (i32, i32) {
    %c0_i32 = arith.constant 0 : i32
    %c0_i32_0 = arith.constant 0 : i32
    %c0_i32_1 = arith.constant 0 : i32
    return %c0_i32, %c0_i32_0 : i32, i32
  }
  func.func @transform_12(%arg0: i32) -> (i32, i32) {
    %c0_i32 = arith.constant 0 : i32
    %c0_i32_0 = arith.constant 0 : i32
    %c0_i32_1 = arith.constant 0 : i32
    return %c0_i32, %c0_i32_0 : i32, i32
  }
  func.func @transform_13(%arg0: i32) -> (i32, i32, i32) {
    %c0_i32 = arith.constant 0 : i32
    %c0_i32_0 = arith.constant 0 : i32
    %c0_i32_1 = arith.constant 0 : i32
    return %arg0, %c0_i32, %c0_i32_0 : i32, i32, i32
  }
  func.func @transform_14(%arg0: i32) -> (i32, i32, i32, i32) {
    %c0_i32 = arith.constant 0 : i32
    %c0_i32_0 = arith.constant 0 : i32
    %c0_i32_1 = arith.constant 0 : i32
    %c0_i32_2 = arith.constant 0 : i32
    return %arg0, %c0_i32, %c0_i32_0, %c0_i32_1 : i32, i32, i32, i32
  }
}

</mosaic_0001>

<bundles_post_ra>
// kernel: tpu_custom_call.1
= control target key start
LH: loop header
LB: loop body
LE: loop exit
PB: predicated region body
PF: predicated region fallthrough
CT: control target
= control target key end

     0   :  { %s3022_s0 = inlined_call_operand.hbm [shape: f32[2,8,32], index: 0, kind: input, shape index: {}]   ;;  %s3023_s1 = inlined_call_operand.hbm [shape: bf16[32,192], index: 1, kind: input, shape index: {}]   ;;  %s3024_s2 = inlined_call_operand.hbm [shape: f32[1,192], index: 2, kind: input, shape index: {}]   ;;  %s3025_s3 = inlined_call_operand.hbm [shape: bf16[64,32], index: 3, kind: input, shape index: {}]   ;;  %s3026_s4 = inlined_call_operand.hbm [shape: f32[1,32], index: 4, kind: input, shape index: {}]   ;;  %s3027_s5 = inlined_call_operand.hbm [shape: f32[1,32], index: 5, kind: input, shape index: {}]   ;;  %s3028_s6 = inlined_call_operand.hbm [shape: f32[1,32], index: 6, kind: input, shape index: {}]   ;;  %s3029_s7 = inlined_call_operand.hbm [shape: bf16[32,64], index: 7, kind: input, shape index: {}]   ;;  %s3030_s8 = inlined_call_operand.hbm [shape: f32[1,64], index: 8, kind: input, shape index: {}]   ;;  %s3031_s9 = inlined_call_operand.hbm [shape: bf16[64,32], index: 9, kind: input, shape index: {}]   ;;  %s3032_s10 = inlined_call_operand.hbm [shape: f32[1,32], index: 10, kind: input, shape index: {}]   ;;  %s3033_s11 = inlined_call_operand.hbm [shape: f32[1,32], index: 11, kind: input, shape index: {}]   ;;  %s3034_s12 = inlined_call_operand.hbm [shape: f32[1,32], index: 12, kind: input, shape index: {}]   ;;  %s3035_s13 = inlined_call_operand.hbm [shape: f32[2,8,32], index: 13, kind: output, shape index: {0}]   ;;  %s3036_s14 = inlined_call_operand.hbm [shape: f32[2,2,8,8], index: 14, kind: output, shape index: {1}]  }
   0x1   :  { %3050 = sst [smem:[#allocation39_spill]] %s3022_s0 }
   0x2   :  { %3051 = sst [smem:[#allocation40_spill]] %s3023_s1 }
   0x3   :  { %3052 = sst [smem:[#allocation41_spill]] %s3024_s2 }
   0x4   :  { %3053 = sst [smem:[#allocation42_spill]] %s3025_s3 }
   0x5   :  { %3054 = sst [smem:[#allocation43_spill]] %s3026_s4 }
   0x6   :  { %3055 = sst [smem:[#allocation44_spill]] %s3035_s13 }
   0x7   :  { %3056 = sst [smem:[#allocation45_spill]] %s3036_s14 }
   0x8   :  { %20 = vsyncpa [#allocation4], 0 }
   0x9   :  { %22 = vsyncpa [#allocation4 + $0x1], 0 }
   0xa   :  { %23 = vsyncpa [#allocation7], 0 }
   0xb   :  { %24 = vsyncpa [#allocation10], 0 }
   0xc   :  { %25 = vsyncpa [#allocation13], 0 }
   0xd   :  { %26 = vsyncpa [#allocation16], 0 }
   0xe   :  { %27 = vsyncpa [#allocation19], 0 }
   0xf   :  { %28 = vsyncpa [#allocation22], 0 }
  0x10   :  { %29 = vsyncpa [#allocation5], 0 }
  0x11   :  { %31 = vsyncpa [#allocation5 + $0x1], 0 }
  0x12   :  { %32 = vsyncpa [#allocation26], 0 }
  0x13   :  { %34 = vsyncpa [#allocation26 + $0x1], 0  ;;  %s2475_s29 = smov 0   ;;  %s2477_s30 = smov 0  }
  0x14   :  { %s2479_s15 = smov 0   ;;  %s2481_s16 = smov 0  }
  0x15 LB: > { %3057 = sst [smem:[#allocation36_spill]] %s2359_s29  ;;  %s2373_s17 = smov [#allocation6]   ;;  %s2371_s16 = sphi %s2481_s16, %s3103_s16   ;;  %s2367_s15 = sphi %s2479_s15, %s3102_s15   ;;  %s2363_s30 = sphi %s2477_s30, %s3101_s30   ;;  %s2359_s29 = sphi %s2475_s29, %s3100_s29  }
  0x16   : > { %s387_s18 = sshll.u32 %s2373_s17, 4  ;;  %s2496_s19 = sadd.s32 4294967295, %s2371_s16   ;;  %s2501_s18 = int_to_ptr.vmem [resolvable:$true] %s387_s18 }
  0x17   : > { %3058 = sst [smem:[#allocation37_spill]] %s2496_s19  ;;  %p1522_p0 = scmp.ge.s32.totalorder %s2371_s16, 1 }
  0x18   : > { %p3044_p1 = scmp.eq.s32.totalorder %s2496_s19, 0  ;;  %p375_p2 = scmp.lt.s32.totalorder %s2371_s16, 3 }
  0x19   : > { %s2374_s21 = smov [#allocation9]   ;;  %s2375_s24 = smov [#allocation12]  }
  0x1a   : > { %p2503_p3 = pnand %p1522_p0, %p375_p2  ;;  %s411_s22 = sshll.u32 %s2374_s21, 4  ;;  %s2516_s22 = int_to_ptr.vmem [resolvable:$true] %s411_s22 }
  0x1b   : > { %s2518_s25 = sshll.u32 %s2375_s24, 4  ;;  %s3062_s1 = sld [smem:[#allocation40_spill]]  ;;  %s437_s25 = int_to_ptr.vmem [resolvable:$true] %s2518_s25 }
  0x1c   : > { %s3059_s20 = scalar_select %p2503_p3, 1, 0 }
  0x1d   : > { %p1725_p5 = pneg %p2503_p3 }
  0x1e   : > { %3060 = sst [smem:[#allocation38_spill]] %s3059_s20 }
  0x1f   : > { %p2512_p6 = pnand %p1725_p5, %p3044_p1 }
  0x21   : > { %s1883_s28 = scalar_lea.hbm %s3062_s1, 512  ;;  %p2528_p8 = pneg %p2512_p6 }
  0x22   : > { %p1884_p7 = scmp.ne.s32.totalorder %s3062_s1, %s1883_s28  ;;  %p1890_p11 = scmp.lt.u32.totalorder %s1883_s28, %s3062_s1 }
  0x24   : > { %p1886_p9 = pnand %p2528_p8, %p1884_p7 }
  0x26   : > { %p1887_p10 = pneg %p1886_p9 }
  0x28   : > { %p1892_p12 = pnand %p1890_p11, %p1887_p10 }
  0x2a   : > { %1895 = shalt.err (!%p1892_p12)
}
  0x2b   : > { %s1896_s13 = scalar_lea.vmem %s2501_s18, 512  ;;  %p1904_p5 = scmp.lt.s32.totalorder %s2501_s18, %s2501_s18 }
  0x2c   : > { %p1897_p13 = scmp.ne.s32.totalorder %s2501_s18, %s1896_s13  ;;  %p1905_p4 = scmp.lt.s32.totalorder %s1896_s13, %s1896_s13 }
  0x2e   : > { %p1899_p0 = pnand %p1897_p13, %p2528_p8  ;;  %p1906_p7 = por %p1905_p4, %p1904_p5 }
  0x30   : > { %p1900_p2 = pneg %p1899_p0 }
  0x32   : > { %p1907_p9 = pnand %p1906_p7, %p1900_p2 }
  0x34   : > { %1910 = shalt.err (!%p1907_p9)
}
  0x35   : > { %s2376_s26 = smov 128   ;;  %s2377_s14 = smov 8  }
  0x36   : > { %1728 = dma.hbm_to_vmem [thread:$0]  (!%p2512_p6), %s3062_s1, 512, %s2501_s18, [#allocation7], %s2376_s26, %s2376_s26, %s2377_s14  }
  0x37   : > { %s3064_s3 = sld [smem:[#allocation42_spill]] }
  0x3d   : > { %s1911_s20 = scalar_lea.hbm %s3064_s3, 512 }
  0x3e   : > { %p1912_p4 = scmp.ne.s32.totalorder %s3064_s3, %s1911_s20  ;;  %p1918_p12 = scmp.lt.u32.totalorder %s1911_s20, %s3064_s3 }
  0x40   : > { %p1914_p10 = pnand %p1912_p4, %p2528_p8 }
  0x42   : > { %p1915_p11 = pneg %p1914_p10 }
  0x44   : > { %p1920_p13 = pnand %p1918_p12, %p1915_p11 }
  0x46   : > { %1923 = shalt.err (!%p1920_p13)
}
  0x47   : > { %s1924_s18 = scalar_lea.vmem %s2516_s22, 512  ;;  %p1932_p7 = scmp.lt.s32.totalorder %s2516_s22, %s2516_s22 }
  0x48   : > { %p1925_p0 = scmp.ne.s32.totalorder %s2516_s22, %s1924_s18  ;;  %p1933_p9 = scmp.lt.s32.totalorder %s1924_s18, %s1924_s18 }
  0x4a   : > { %p1927_p2 = pnand %p1925_p0, %p2528_p8  ;;  %p1934_p4 = por %p1933_p9, %p1932_p7 }
  0x4c   : > { %p1928_p5 = pneg %p1927_p2 }
  0x4e   : > { %p1935_p10 = pnand %p1934_p4, %p1928_p5 }
  0x50   : > { %1938 = shalt.err (!%p1935_p10)
}
  0x51   : > { %s3046_s0 = smov 64   ;;  %s2379_s29 = smov 4  }
  0x52   : > { %1734 = dma.hbm_to_vmem [thread:$0]  (!%p2512_p6), %s3064_s3, 512, %s2516_s22, [#allocation10], %s3046_s0, %s3046_s0, %s2379_s29  }
  0x53   : > { %s1939_s27 = scalar_lea.hbm %s3027_s5, 16 }
  0x54   : > { %p1940_p11 = scmp.ne.s32.totalorder %s3027_s5, %s1939_s27  ;;  %p1946_p0 = scmp.lt.u32.totalorder %s1939_s27, %s3027_s5 }
  0x56   : > { %p1942_p12 = pnand %p1940_p11, %p2528_p8 }
  0x58   : > { %p1943_p13 = pneg %p1942_p12 }
  0x5a   : > { %p1948_p2 = pnand %p1946_p0, %p1943_p13 }
  0x5c   : > { %1951 = shalt.err (!%p1948_p2)
}
  0x5d   : > { %s1952_s18 = scalar_lea.vmem %s437_s25, 16  ;;  %s1959_s22 = scalar_lea.vmem %s437_s25, 32 }
  0x5e   : > { %p1953_p5 = scmp.ne.s32.totalorder %s437_s25, %s1952_s18  ;;  %p1960_p4 = scmp.lt.s32.totalorder %s437_s25, %s437_s25 }
  0x5f   : > { %p1961_p10 = scmp.lt.s32.totalorder %s1959_s22, %s1952_s18 }
  0x60   : > { %p1955_p7 = pnand %p1953_p5, %p2528_p8 }
  0x61   : > { %p1962_p1 = por %p1961_p10, %p1960_p4 }
  0x62   : > { %p1956_p9 = pneg %p1955_p7 }
  0x64   : > { %p1963_p3 = pnand %p1962_p1, %p1956_p9 }
  0x66   : > { %1966 = shalt.err (!%p1963_p3)
}
  0x67   : > { %1740 = dma.hbm_to_vmem [thread:$0]  (!%p2512_p6), %s3027_s5, 16, %s437_s25, [#allocation13]  }
  0x68   : > { %s2380_s26 = smov [#allocation15]   ;;  %s2381_s27 = smov [#allocation18]  }
  0x69   : > { %s457_s14 = sshll.u32 %s2380_s26, 4  ;;  %s481_s28 = sshll.u32 %s2381_s27, 4  ;;  %s458_s14 = int_to_ptr.vmem [resolvable:$true] %s457_s14  ;;  %s482_s28 = int_to_ptr.vmem [resolvable:$true] %s481_s28 }
  0x6a   : > { %s1967_s13 = scalar_lea.hbm %s3029_s7, 256 }
  0x6b   : > { %p1968_p1 = scmp.ne.s32.totalorder %s3029_s7, %s1967_s13  ;;  %p1974_p12 = scmp.lt.u32.totalorder %s1967_s13, %s3029_s7 }
  0x6d   : > { %p1970_p3 = pnand %p1968_p1, %p2528_p8 }
  0x6f   : > { %p1971_p11 = pneg %p1970_p3 }
  0x71   : > { %p1976_p13 = pnand %p1974_p12, %p1971_p11 }
  0x73   : > { %1979 = shalt.err (!%p1976_p13)
}
  0x74   : > { %s1980_s25 = scalar_lea.vmem %s458_s14, 256  ;;  %p1988_p7 = scmp.lt.s32.totalorder %s458_s14, %s458_s14 }
  0x75   : > { %p1981_p0 = scmp.ne.s32.totalorder %s458_s14, %s1980_s25  ;;  %p1989_p9 = scmp.lt.s32.totalorder %s1980_s25, %s1980_s25 }
  0x77   : > { %p1983_p2 = pnand %p1981_p0, %p2528_p8  ;;  %p1990_p4 = por %p1989_p9, %p1988_p7 }
  0x79   : > { %p1984_p5 = pneg %p1983_p2 }
  0x7b   : > { %p1991_p10 = pnand %p1990_p4, %p1984_p5 }
  0x7d   : > { %1994 = shalt.err (!%p1991_p10)
}
  0x7e   : > { %s3065_s20 = smov 64   ;;  %s1995_s24 = scalar_lea.hbm %s3031_s9, 512 }
  0x7f   : > { %1746 = dma.hbm_to_vmem [thread:$0]  (!%p2512_p6), %s3029_s7, 256, %s458_s14, [#allocation16], %s3065_s20, %s3065_s20, %s2379_s29  }
  0x80   : > { %p1996_p1 = scmp.ne.s32.totalorder %s3031_s9, %s1995_s24  ;;  %p2002_p12 = scmp.lt.u32.totalorder %s1995_s24, %s3031_s9 }
  0x82   : > { %p1998_p3 = pnand %p1996_p1, %p2528_p8 }
  0x84   : > { %p1999_p11 = pneg %p1998_p3 }
  0x86   : > { %p2004_p13 = pnand %p2002_p12, %p1999_p11 }
  0x88   : > { %2007 = shalt.err (!%p2004_p13)
}
  0x89   : > { %s2008_s25 = scalar_lea.vmem %s482_s28, 512  ;;  %p2016_p7 = scmp.lt.s32.totalorder %s482_s28, %s482_s28 }
  0x8a   : > { %p2009_p0 = scmp.ne.s32.totalorder %s482_s28, %s2008_s25  ;;  %p2017_p9 = scmp.lt.s32.totalorder %s2008_s25, %s2008_s25 }
  0x8c   : > { %p2011_p2 = pnand %p2009_p0, %p2528_p8  ;;  %p2018_p4 = por %p2017_p9, %p2016_p7 }
  0x8e   : > { %p2012_p5 = pneg %p2011_p2 }
  0x90   : > { %p2019_p10 = pnand %p2018_p4, %p2012_p5 }
  0x92   : > { %2022 = shalt.err (!%p2019_p10)
}
  0x93   : > { %1752 = dma.hbm_to_vmem [thread:$0]  (!%p2512_p6), %s3031_s9, 512, %s482_s28, [#allocation19], %s3065_s20, %s3065_s20, %s2379_s29  }
  0x94   : > { %s2382_s26 = smov [#allocation21]   ;;  %s2383_s17 = smov [#allocation8]  }
  0x95   : > { %s506_s27 = sshll.u32 %s2382_s26, 4  ;;  %s401_s24 = sshll.u32 %s2383_s17, 4  ;;  %s507_s27 = int_to_ptr.vmem [resolvable:$true] %s506_s27  ;;  %s402_s24 = int_to_ptr.vmem [resolvable:$true] %s401_s24 }
  0x96   : > { %s2023_s22 = scalar_lea.hbm %s3033_s11, 16 }
  0x97   : > { %p2024_p1 = scmp.ne.s32.totalorder %s3033_s11, %s2023_s22  ;;  %p2030_p12 = scmp.lt.u32.totalorder %s2023_s22, %s3033_s11 }
  0x99   : > { %p2026_p3 = pnand %p2024_p1, %p2528_p8 }
  0x9b   : > { %p2027_p11 = pneg %p2026_p3 }
  0x9d   : > { %p2032_p13 = pnand %p2030_p12, %p2027_p11 }
  0x9f   : > { %2035 = shalt.err (!%p2032_p13)
}
  0xa0   : > { %s2036_s29 = scalar_lea.vmem %s507_s27, 16  ;;  %s2043_s28 = scalar_lea.vmem %s507_s27, 32 }
  0xa1   : > { %p2037_p0 = scmp.ne.s32.totalorder %s507_s27, %s2036_s29  ;;  %p2044_p7 = scmp.lt.s32.totalorder %s507_s27, %s507_s27 }
  0xa2   : > { %p2045_p9 = scmp.lt.s32.totalorder %s2043_s28, %s2036_s29 }
  0xa3   : > { %p2039_p2 = pnand %p2037_p0, %p2528_p8 }
  0xa4   : > { %p2046_p4 = por %p2045_p9, %p2044_p7 }
  0xa5   : > { %p2040_p5 = pneg %p2039_p2 }
  0xa7   : > { %p2047_p10 = pnand %p2046_p4, %p2040_p5 }
  0xa9   : > { %2050 = shalt.err (!%p2047_p10)
}
  0xaa   : > { %1758 = dma.hbm_to_vmem [thread:$0]  (!%p2512_p6), %s3033_s11, 16, %s507_s27, [#allocation22]  }
  0xab   : > { %s3066_s2 = sld [smem:[#allocation41_spill]] }
  0xb1   : > { %s2051_s17 = scalar_lea.hbm %s3066_s2, 32 }
  0xb2   : > { %p2052_p1 = scmp.ne.s32.totalorder %s3066_s2, %s2051_s17  ;;  %p2058_p12 = scmp.lt.u32.totalorder %s2051_s17, %s3066_s2 }
  0xb4   : > { %p2054_p3 = pnand %p2052_p1, %p2528_p8 }
  0xb6   : > { %p2055_p11 = pneg %p2054_p3 }
  0xb8   : > { %p2060_p13 = pnand %p2058_p12, %p2055_p11 }
  0xba   : > { %2063 = shalt.err (!%p2060_p13)
}
  0xbb   : > { %s2064_s25 = scalar_lea.vmem %s402_s24, 32  ;;  %p2072_p7 = scmp.lt.s32.totalorder %s402_s24, %s402_s24 }
  0xbc   : > { %p2065_p0 = scmp.ne.s32.totalorder %s402_s24, %s2064_s25  ;;  %p2073_p9 = scmp.lt.s32.totalorder %s2064_s25, %s2064_s25 }
  0xbe   : > { %p2067_p2 = pnand %p2065_p0, %p2528_p8  ;;  %p2074_p4 = por %p2073_p9, %p2072_p7 }
  0xc0   : > { %p2068_p5 = pneg %p2067_p2 }
  0xc2   : > { %p2075_p10 = pnand %p2074_p4, %p2068_p5 }
  0xc4   : > { %2078 = shalt.err (!%p2075_p10)
}
  0xc5   : > { %1731 = dma.hbm_to_vmem [thread:$0]  (!%p2512_p6), %s3066_s2, 32, %s402_s24, [#allocation7]  }
  0xc6   : > { %s2384_s29 = smov [#allocation11]   ;;  %s2385_s20 = smov [#allocation14]  }
  0xc7   : > { %s425_s28 = sshll.u32 %s2384_s29, 4  ;;  %s447_s0 = sshll.u32 %s2385_s20, 4  ;;  %s426_s28 = int_to_ptr.vmem [resolvable:$true] %s425_s28  ;;  %s448_s0 = int_to_ptr.vmem [resolvable:$true] %s447_s0 }
  0xc8   : > { %s3067_s4 = sld [smem:[#allocation43_spill]] }
  0xce   : > { %s2079_s17 = scalar_lea.hbm %s3067_s4, 16 }
  0xcf   : > { %p2080_p1 = scmp.ne.s32.totalorder %s3067_s4, %s2079_s17  ;;  %p2086_p12 = scmp.lt.u32.totalorder %s2079_s17, %s3067_s4 }
  0xd1   : > { %p2082_p3 = pnand %p2080_p1, %p2528_p8 }
  0xd3   : > { %p2083_p11 = pneg %p2082_p3 }
  0xd5   : > { %p2088_p13 = pnand %p2086_p12, %p2083_p11 }
  0xd7   : > { %2091 = shalt.err (!%p2088_p13)
}
  0xd8   : > { %s2092_s24 = scalar_lea.vmem %s426_s28, 16  ;;  %s2099_s25 = scalar_lea.vmem %s426_s28, 32 }
  0xd9   : > { %p2093_p0 = scmp.ne.s32.totalorder %s426_s28, %s2092_s24  ;;  %p2100_p7 = scmp.lt.s32.totalorder %s426_s28, %s426_s28 }
  0xda   : > { %p2101_p9 = scmp.lt.s32.totalorder %s2099_s25, %s2092_s24 }
  0xdb   : > { %p2095_p2 = pnand %p2093_p0, %p2528_p8 }
  0xdc   : > { %p2102_p4 = por %p2101_p9, %p2100_p7 }
  0xdd   : > { %p2096_p5 = pneg %p2095_p2 }
  0xdf   : > { %p2103_p10 = pnand %p2102_p4, %p2096_p5 }
  0xe1   : > { %2106 = shalt.err (!%p2103_p10)
}
  0xe2   : > { %1737 = dma.hbm_to_vmem [thread:$0]  (!%p2512_p6), %s3067_s4, 16, %s426_s28, [#allocation10]  }
  0xe3   : > { %s2107_s1 = scalar_lea.hbm %s3028_s6, 16 }
  0xe4   : > { %p2108_p1 = scmp.ne.s32.totalorder %s3028_s6, %s2107_s1  ;;  %p2114_p12 = scmp.lt.u32.totalorder %s2107_s1, %s3028_s6 }
  0xe6   : > { %p2110_p3 = pnand %p2108_p1, %p2528_p8 }
  0xe8   : > { %p2111_p11 = pneg %p2110_p3 }
  0xea   : > { %p2116_p13 = pnand %p2114_p12, %p2111_p11 }
  0xec   : > { %2119 = shalt.err (!%p2116_p13)
}
  0xed   : > { %s2120_s22 = scalar_lea.vmem %s448_s0, 16  ;;  %s2127_s28 = scalar_lea.vmem %s448_s0, 32 }
  0xee   : > { %p2121_p0 = scmp.ne.s32.totalorder %s448_s0, %s2120_s22  ;;  %p2128_p7 = scmp.lt.s32.totalorder %s448_s0, %s448_s0 }
  0xef   : > { %p2129_p9 = scmp.lt.s32.totalorder %s2127_s28, %s2120_s22 }
  0xf0   : > { %p2123_p2 = pnand %p2121_p0, %p2528_p8 }
  0xf1   : > { %p2130_p4 = por %p2129_p9, %p2128_p7 }
  0xf2   : > { %p2124_p5 = pneg %p2123_p2 }
  0xf4   : > { %p2131_p10 = pnand %p2130_p4, %p2124_p5 }
  0xf6   : > { %2134 = shalt.err (!%p2131_p10)
}
  0xf7   : > { %1743 = dma.hbm_to_vmem [thread:$0]  (!%p2512_p6), %s3028_s6, 16, %s448_s0, [#allocation13]  }
  0xf8   : > { %s2386_s25 = smov [#allocation17]   ;;  %s2387_s14 = smov [#allocation20]  }
  0xf9   : > { %s471_s27 = sshll.u32 %s2386_s25, 4  ;;  %s495_s29 = sshll.u32 %s2387_s14, 4  ;;  %s472_s27 = int_to_ptr.vmem [resolvable:$true] %s471_s27  ;;  %s496_s29 = int_to_ptr.vmem [resolvable:$true] %s495_s29 }
  0xfa   : > { %s2135_s26 = scalar_lea.hbm %s3030_s8, 16 }
  0xfb   : > { %p2136_p1 = scmp.ne.s32.totalorder %s3030_s8, %s2135_s26  ;;  %p2142_p12 = scmp.lt.u32.totalorder %s2135_s26, %s3030_s8 }
  0xfd   : > { %p2138_p3 = pnand %p2136_p1, %p2528_p8 }
  0xff   : > { %p2139_p11 = pneg %p2138_p3 }
 0x101   : > { %p2144_p13 = pnand %p2142_p12, %p2139_p11 }
 0x103   : > { %2147 = shalt.err (!%p2144_p13)
}
 0x104   : > { %s2148_s0 = scalar_lea.vmem %s472_s27, 16  ;;  %s2155_s28 = scalar_lea.vmem %s472_s27, 32 }
 0x105   : > { %p2149_p0 = scmp.ne.s32.totalorder %s472_s27, %s2148_s0  ;;  %p2156_p7 = scmp.lt.s32.totalorder %s472_s27, %s472_s27 }
 0x106   : > { %p2157_p9 = scmp.lt.s32.totalorder %s2155_s28, %s2148_s0 }
 0x107   : > { %p2151_p2 = pnand %p2149_p0, %p2528_p8 }
 0x108   : > { %p2158_p4 = por %p2157_p9, %p2156_p7 }
 0x109   : > { %p2152_p5 = pneg %p2151_p2 }
 0x10b   : > { %p2159_p10 = pnand %p2158_p4, %p2152_p5 }
 0x10d   : > { %2162 = shalt.err (!%p2159_p10)
}
 0x10e   : > { %1749 = dma.hbm_to_vmem [thread:$0]  (!%p2512_p6), %s3030_s8, 16, %s472_s27, [#allocation16]  }
 0x10f   : > { %s2163_s20 = scalar_lea.hbm %s3032_s10, 16 }
 0x110   : > { %p2164_p1 = scmp.ne.s32.totalorder %s3032_s10, %s2163_s20  ;;  %p2170_p12 = scmp.lt.u32.totalorder %s2163_s20, %s3032_s10 }
 0x112   : > { %p2166_p3 = pnand %p2164_p1, %p2528_p8 }
 0x114   : > { %p2167_p11 = pneg %p2166_p3 }
 0x116   : > { %p2172_p13 = pnand %p2170_p12, %p2167_p11 }
 0x118   : > { %2175 = shalt.err (!%p2172_p13)
}
 0x119   : > { %s2176_s18 = scalar_lea.vmem %s496_s29, 16  ;;  %s2183_s27 = scalar_lea.vmem %s496_s29, 32 }
 0x11a   : > { %p2177_p0 = scmp.ne.s32.totalorder %s496_s29, %s2176_s18  ;;  %p2184_p7 = scmp.lt.s32.totalorder %s496_s29, %s496_s29 }
 0x11b   : > { %p2185_p9 = scmp.lt.s32.totalorder %s2183_s27, %s2176_s18 }
 0x11c   : > { %p2179_p2 = pnand %p2177_p0, %p2528_p8 }
 0x11d   : > { %p2186_p4 = por %p2185_p9, %p2184_p7 }
 0x11e   : > { %p2180_p5 = pneg %p2179_p2 }
 0x120   : > { %p2187_p10 = pnand %p2186_p4, %p2180_p5 }
 0x122   : > { %2190 = shalt.err (!%p2187_p10)
}
 0x123   : > { %1755 = dma.hbm_to_vmem [thread:$0]  (!%p2512_p6), %s3032_s10, 16, %s496_s29, [#allocation19]  }
 0x124   : > { %s2388_s28 = smov [#allocation23]   ;;  %s2191_s14 = scalar_lea.hbm %s3034_s12, 16 }
 0x125   : > { %s517_s19 = sshll.u32 %s2388_s28, 4  ;;  %p2192_p1 = scmp.ne.s32.totalorder %s3034_s12, %s2191_s14  ;;  %s518_s19 = int_to_ptr.vmem [resolvable:$true] %s517_s19 }
 0x126   : > { %p2198_p12 = scmp.lt.u32.totalorder %s2191_s14, %s3034_s12 }
 0x127   : > { %p2194_p3 = pnand %p2192_p1, %p2528_p8 }
 0x129   : > { %p2195_p11 = pneg %p2194_p3 }
 0x12b   : > { %p2200_p13 = pnand %p2198_p12, %p2195_p11 }
 0x12d   : > { %2203 = shalt.err (!%p2200_p13)
}
 0x12e   : > { %s2204_s29 = scalar_lea.vmem %s518_s19, 16  ;;  %s2211_s13 = scalar_lea.vmem %s518_s19, 32 }
 0x12f   : > { %p2205_p0 = scmp.ne.s32.totalorder %s518_s19, %s2204_s29  ;;  %p2212_p7 = scmp.lt.s32.totalorder %s518_s19, %s518_s19 }
 0x130   : > { %p2213_p9 = scmp.lt.s32.totalorder %s2211_s13, %s2204_s29 }
 0x131   : > { %p2207_p2 = pnand %p2205_p0, %p2528_p8 }
 0x132   : > { %p2214_p4 = por %p2213_p9, %p2212_p7 }
 0x133   : > { %p2208_p5 = pneg %p2207_p2 }
 0x135   : > { %p2215_p10 = pnand %p2214_p4, %p2208_p5 }
 0x137   : > { %2218 = shalt.err (!%p2215_p10)
}
 0x138   : > { %s3068_s21 = sld [smem:[#allocation36_spill]]  ;;  %s3069_s22 = sld [smem:[#allocation37_spill]] }
 0x139   : > { %1761 = dma.hbm_to_vmem [thread:$0]  (!%p2512_p6), %s3034_s12, 16, %s518_s19, [#allocation22]  }
 0x13a   : > { %s1521_s0 = sadd.s32 4294967294, %s2371_s16   ;;  %s2764_s23 = sadd.s32 1, %s2371_s16  }
 0x13b   : > { %s44_s28 = ssub.s32 %s2371_s16, %s2764_s23  ;;  %s47_s24 = sadd.s32 1, %s2367_s15 }
 0x13c   : > { %p45_p8 = scmp.eq.s32.totalorder %s44_s28, 0  ;;  %p54_p1 = scmp.ne.s32.totalorder %s2367_s15, %s2363_s30 }
 0x13d   : > { %p55_p3 = scmp.eq.s32.totalorder %s2371_s16, 0  ;;  %p342_p2 = scmp.eq.s32.totalorder %s1521_s0, 1 }
 0x13e   : > { %p60_p11 = scmp.ne.s32.totalorder %s2363_s30, %s3068_s21  ;;  %p3071_p13 = scmp.eq.s32.totalorder %s3069_s22, 0 }
 0x13f   : > { %s2775_s25 = scalar_select %p45_p8, %s2367_s15, %s47_s24  }
 0x140   : > { %p2777_p12 = por %p55_p3, %p54_p1  ;;  %p2783_p6 = por %p3071_p13, %p60_p11 }
 0x141   : > { %p336_p0 = scmp.eq.s32.totalorder %s3069_s22, 1  ;;  %p1785_p5 = scmp.lt.s32.totalorder %s2371_s16, 2 }
 0x142   : > { %s528_s20 = sand.u32 1, %s2367_s15   ;;  %p2794_p9 = por %p342_p2, %p60_p11 }
 0x143   : > { %p2790_p7 = por %p336_p0, %p54_p1  ;;  %s1536_s17 = sshll.u32 %s528_s20, 3 }
 0x144   : > { %s3074_s26 = scalar_select %p2794_p9, 1, 0 }
 0x145   : > { %s3073_s1 = scalar_select %p2790_p7, 1, 0 }
 0x146   : > { %s1537_s29 = sshll.u32 %s2371_s16, 7  ;;  %s3075_s27 = sld [smem:[#allocation39_spill]] }
 0x147   : > { %s532_s22 = scalar_lea.vmem [#allocation3], %s1536_s17  ;;  %p2808_p4 = pnand %p1785_p5, %p2777_p12 }
 0x148   : > { %s539_s0 = sshll.u32 %s532_s22, 4  ;;  %s529_s24 = scalar_lea.sflag [#allocation4], %s528_s20  ;;  %s2804_s0 = int_to_ptr.vmem [resolvable:$true] %s539_s0 }
 0x149   : > { %p2221_p8 = pneg %p2808_p4 }
 0x14c   : > { %s2802_s21 = scalar_lea.hbm %s3075_s27, %s1537_s29  ;;  %s2224_s13 = scalar_lea.hbm %s3075_s27, 256 }
 0x14d   : > { %s2219_s2 = scalar_lea.hbm %s2802_s21, 128  ;;  %p2225_p11 = scmp.lt.u32.totalorder %s2802_s21, %s3075_s27 }
 0x14e   : > { %p2220_p10 = scmp.ne.s32.totalorder %s2802_s21, %s2219_s2  ;;  %p2226_p12 = scmp.lt.u32.totalorder %s2224_s13, %s2219_s2 }
 0x14f   : > { %p2228_p0 = scmp.lt.u32.totalorder %s2219_s2, %s2802_s21 }
 0x150   : > { %p2222_p1 = pnand %p2221_p8, %p2220_p10  ;;  %p2227_p13 = por %p2226_p12, %p2225_p11 }
 0x152   : > { %p2223_p3 = pneg %p2222_p1  ;;  %p2229_p2 = por %p2228_p0, %p2227_p13 }
 0x154   : > { %p2230_p5 = pnand %p2229_p2, %p2223_p3 }
 0x156   : > { %2233 = shalt.err (!%p2230_p5)
}
 0x157   : > { %s2234_s20 = scalar_lea.vmem %s2804_s0, 128  ;;  %s2389_s22 = smov [#allocation3]  }
 0x158   : > { %p2235_p10 = scmp.ne.s32.totalorder %s2804_s0, %s2234_s20  ;;  %s2239_s17 = sshll.u32 %s2389_s22, 4  ;;  %s2240_s17 = int_to_ptr.vmem [resolvable:$false] %s2239_s17 }
 0x159   : > { %s2241_s29 = scalar_lea.vmem %s2240_s17, 256  ;;  %p2242_p7 = scmp.lt.s32.totalorder %s2804_s0, %s2240_s17 }
 0x15a   : > { %p2237_p1 = pnand %p2235_p10, %p2221_p8  ;;  %p2243_p11 = scmp.lt.s32.totalorder %s2241_s29, %s2234_s20 }
 0x15c   : > { %p2238_p9 = pneg %p2237_p1  ;;  %p2244_p12 = por %p2243_p11, %p2242_p7 }
 0x15e   : > { %p2245_p13 = pnand %p2244_p12, %p2238_p9 }
 0x160   : > { %2248 = shalt.err (!%p2245_p13)
}
 0x161   : > { %1765 = dma.hbm_to_vmem [thread:$0]  (!%p2808_p4), %s2802_s21, 128, %s2804_s0, %s529_s24  }
 0x162   : > { %s3077_s2 = sld [smem:[#allocation38_spill]] }
 0x168   : > { %p3078_p3 = scmp.ne.s32.totalorder %s3077_s2, 0 }
 0x169   : > { %s2840_s13 = sand.u32 (!%p3078_p3), 1, %s2363_s30  }
 0x16a   : > { %548 = sbr.rel (%p3078_p3) target bundleno = 2907 (0xb5b), region = 72  ;;  %s3049_s14 = sshll.u32 (!%p3078_p3), %s2840_s13, 3 }
 0x16b   : > { %s551_s18 = scalar_lea.sflag (!%p3078_p3), [#allocation4], %s2840_s13  ;;  %s554_s20 = scalar_lea.vmem (!%p3078_p3), [#allocation3], %s3049_s14 }
 0x171   : > { %2322 = dma.done.wait (%p2783_p6), %s551_s18, 128  }
 0x172   : > { %2324 = vsyncadd (%p2783_p6), %s551_s18, 4294967168  ;;  %s3079_s21 = sld [smem:[#allocation37_spill]] }
 0x178   : > { %p3080_p7 = scmp.eq.s32.totalorder %s3079_s21, 0 }
 0x17a   : > { %2326 = dma.done.wait (%p3080_p7), [#allocation7], 544   ;;  %p3081_p9 = pmov %p3080_p7 }
 0x17b   : > { %p3082_p4 = pmov %p3080_p7 }
 0x17c   : > { %2328 = vsyncadd (%p3081_p9), [#allocation7], 4294966752 }
 0x17d   : > { %2330 = dma.done.wait (%p3082_p4), [#allocation10], 528   ;;  %p3083_p8 = pmov %p3082_p4 }
 0x17e   : > { %p3084_p0 = pmov %p3082_p4 }
 0x17f   : > { %2332 = vsyncadd (%p3083_p8), [#allocation10], 4294966768 }
 0x180   : > { %2334 = dma.done.wait (%p3084_p0), [#allocation13], 32   ;;  %p3085_p2 = pmov %p3084_p0 }
 0x181   : > { %p3086_p6 = pmov %p3084_p0 }
 0x182   : > { %2336 = vsyncadd (%p3085_p2), [#allocation13], 4294967264 }
 0x183   : > { %2338 = dma.done.wait (%p3086_p6), [#allocation16], 272   ;;  %p3087_p5 = pmov %p3084_p0 }
 0x184   : > { %p3088_p10 = pmov %p3084_p0 }
 0x185   : > { %2340 = vsyncadd (%p3087_p5), [#allocation16], 4294967024 }
 0x186   : > { %2342 = dma.done.wait (%p3088_p10), [#allocation19], 528   ;;  %p3089_p1 = pmov %p3084_p0 }
 0x187   : > { %p3090_p11 = pmov %p3084_p0 }
 0x188   : > { %2344 = vsyncadd (%p3089_p1), [#allocation19], 4294966768 }
 0x189   : > { %2346 = dma.done.wait (%p3090_p11), [#allocation22], 32   ;;  %p3091_p12 = pmov %p3084_p0 }
 0x18a   : > { %v2390_v0 = vmov 0   ;;  %v1855_v1 = vld [vmem:[#allocation6 + $0x4] ss:$8 sps:$4 sm:$0xff]   ;;  %v1857_v2 = vld [vmem:[#allocation6] ss:$8 sps:$4 sm:$0xff]   ;;  %v2874_v5 = vld [vmem:[%s554_s20] sm:$0xff]  ;;  %v661_v7 = vlaneseq }
 0x18b   : > { %2348 = vsyncadd (%p3091_p12), [#allocation22], 4294967264  ;;  %727 = vmatprep.mubr.bf16.mxu1 %v2390_v0  ;;  %695 = vmatprep.subr.bf16.mxu1 %v1855_v1  ;;  %v1858_v3 = vld [vmem:[#allocation6 + $0x14] ss:$8 sps:$4 sm:$0xff]   ;;  %v1860_v4 = vld [vmem:[#allocation6 + $0x10] ss:$8 sps:$4 sm:$0xff]   ;;  %v658_v6 = vpack.c.bf16 %v2874_v5, %v2874_v5 }
 0x18c   : > { %696 = vmatpush1.bf16.msra.mxu1 %v1857_v2  ;;  %vm691_vm0 = vcmask 261120   ;;  %v662_v8 = vshrl.u32 %v661_v7, 7  ;;  %v2391_v9 = vmov 0.0   ;;  %v659_v11 = vld [vmem:[#allocation8] sm:$0x3]  ;;  %vm2392_vm1 = vmmov 0  }
 0x18d   : > { %697 = vmatprep.subr.bf16.mxu1 %v1858_v3  ;;  %1621 = vmatprep.subr.bf16.mxu0 %v2391_v9  ;;  %s2393_s19 = smov 96   ;;  %s2394_s0 = smov 32   ;;  %vm786_vm2 = vcmask 64512   ;;  %vm805_vm3 = vcmask 1043456   ;;  %v1861_v59 = vld [vmem:[#allocation9] sm:$0xff]   ;;  %v1862_v60 = vld [vmem:[#allocation9 + $0x8] sm:$0xff]  }
 0x18e   : > { %v663_v10 = vsub.s32 0, %v662_v8  ;;  %1623 = vmatprep.mubr.msk.bf16.mxu0 %vm2392_vm1, %v2391_v9  ;;  %v667_v19 = vsub.s32 1, %v662_v8  ;;  %s2395_s28 = smov 64   ;;  %s1553_s24 = sshll.u32 %s2840_s13, 4  ;;  %v1863_v61 = vld [vmem:[#allocation9 + $0x10] sm:$0xff]   ;;  %vm850_vm4 = vcmask 257024  }
 0x18f   : > { %s2905_s22 = scalar_lea.vmem [#allocation25], %s1553_s24  ;;  %v1864_v63 = vld [vmem:[#allocation9 + $0x18] sm:$0xff]   ;;  %vm971_vm5 = vcmask 519424   ;;  %vm1013_vm6 = vcmask 523264   ;;  %s1593_s17 = sshll.u32 %s3079_s21, 8 }
 0x190   : > { %698 = vmatpush1.bf16.msra.mxu1 %v1860_v4  ;;  %v664_v12 = vrot.slane %v659_v11, %v663_v10  ;;  %v668_v20 = vrot.slane %v659_v11, %v667_v19  ;;  %s1302_s29 = sshll.u32 %s2905_s22, 4  ;;  %s3092_s20 = sld [smem:[#allocation45_spill]]  ;;  %s2945_s29 = int_to_ptr.vmem [resolvable:$true] %s1302_s29 }
 0x191   : > { %1615 = vmatprep.subr.bf16.mxu1 %v2391_v9  ;;  %p3093_p3 = scmp.ne.s32.totalorder %s3073_s1, 0  ;;  %s2396_s24 = smov [#allocation25]  }
 0x192   : > { %s2253_s14 = sshll.u32 %s2396_s24, 4  ;;  %s2254_s14 = int_to_ptr.vmem [resolvable:$false] %s2253_s14 }
 0x193   : > { %1558 = vmatmul.mubr.msk.bf16.vlgmr.msra.gmra.mrb[0].mxu1 %vm691_vm0, %v658_v6  ;;  %p2256_p4 = scmp.lt.s32.totalorder %s2945_s29, %s2254_s14 }
 0x194   : > { %1617 = vmatprep.mubr.msk.bf16.mxu1 %vm2392_vm1, %v2391_v9 }
 0x266   : > { %v729_v13 = vpop.f32.mrb[0].mxu1 }
 0x267   : > { %v730_v14 = vadd.f32 %v729_v13, %v664_v12  ;;  %v731_v15 = vpop.f32.mrb[1].mxu1  ;;  %v1565_v13 = vld [vmem:[#allocation11] ss:$0 sm:$0xff] }
 0x268   : > { %v733_v16 = vpop.f32.mrb[2].mxu1  ;;  %v732_v22 = vadd.f32 %v731_v15, %v668_v20 }
 0x269   : > { %v736_v17 = vpack.c.bf16 %v730_v14, %v730_v14  ;;  %v734_v18 = vpop.f32.mrb[3].mxu1 }
 0x26a   : > { %v852_v24 = vpack.c.bf16 %v732_v22, %v732_v22 }
 0x26b   : > { %738 = vrot.lane.b32.xlu0 %v736_v17, %s2393_s19 }
 0x26c   : > { %v859_v25 = vsel %vm691_vm0, %v852_v24, 0 }
 0x26f   : > { %853 = vrot.lane.b32.xlu0 %v736_v17, %s2394_s0 }
 0x2dd   : > { %v739_v21 = vpop.permute.xlu0 %738 }
 0x2de   : > { %v744_v23 = vsel %vm691_vm0, %v739_v21, 0 }
 0x2df   : > { %1616 = vmatpush3.bf16.xpose.msra.mxu1 %v744_v23 }
 0x2e0   : > { %1627 = vmatprep.subr.bf16.mxu1 %v2391_v9 }
 0x2e1   : > { %v854_v26 = vpop.permute.xlu0 %853 }
 0x2e6   : > { %1618 = vmatmul.mubr.msk.bf16.vlgmr.msra.gmra.mrb[4].mxu1 %vm691_vm0, %v736_v17 }
 0x2e7   : > { %1628 = vmatpush3.bf16.xpose.msra.mxu1 %v859_v25  ;;  %1629 = vmatprep.mubr.msk.bf16.mxu1 %vm2392_vm1, %v2391_v9 }
 0x2e8   : > { %1639 = vmatprep.subr.bf16.mxu1 %v2391_v9 }
 0x2ee   : > { %1630 = vmatmul.mubr.msk.bf16.vlgmr.msra.gmra.mrb[8].mxu1 %vm691_vm0, %v854_v26  ;;  %v1865_v26 = vld [vmem:[#allocation15] sm:$0xff]  }
 0x2ef   : > { %1647 = vmatprep.mubr.msk.bf16.mxu1 %vm2392_vm1, %v2391_v9  ;;  %1640 = vmatpush3.bf16.msra.mxu1 %v1861_v59 }
 0x2f0   : > { %1641 = vmatprep.subr.bf16.mxu1 %v2391_v9 }
 0x2f3   : > { %1642 = vmatpush3.bf16.msra.mxu1 %v1862_v60 }
 0x2f4   : > { %1643 = vmatprep.subr.bf16.mxu1 %v2391_v9 }
 0x2f7   : > { %1644 = vmatpush3.bf16.msra.mxu1 %v1863_v61 }
 0x2f8   : > { %1645 = vmatprep.subr.bf16.mxu1 %v2391_v9 }
 0x2fb   : > { %1646 = vmatpush3.bf16.msra.mxu1 %v1864_v63 }
 0x3b9   : > { %v780_v27 = vpop.f32.mrb[4].mxu1 }
 0x3ba   : > { %v1619_v28 = vpop.f32.mrb[5].mxu1  ;;  %v787_v29 = vsel %vm786_vm2, %v780_v27, -inf }
 0x3bb   : > { %788 = vmax.xlane.f32.xlu1 %v787_v29  ;;  %v783_v30 = vpop.f32.mrb[6].mxu1 }
 0x3bc   : > { %v1620_v31 = vpop.f32.mrb[7].mxu1 }
 0x3bd   : > { %v1571_v31 = vld [vmem:[#allocation12] ss:$0 sm:$0xff] }
 0x3c1   : > { %v895_v32 = vpop.f32.mrb[8].mxu1 }
 0x3c2   : > { %v1631_v33 = vpop.f32.mrb[9].mxu1  ;;  %v901_v34 = vsel %vm786_vm2, %v895_v32, -inf }
 0x3c3   : > { %902 = vmax.xlane.f32.xlu1 %v901_v34  ;;  %v898_v35 = vpop.f32.mrb[10].mxu1  ;;  %v1572_v33 = vld [vmem:[#allocation14] ss:$0 sm:$0xff] }
 0x3c4   : > { %v1632_v36 = vpop.f32.mrb[11].mxu1 }
 0x3c5   : > { %v1867_v36 = vld [vmem:[#allocation18] sm:$0xff]  }
 0x3d4   : > { %800 = vrot.lane.b32.xlu1 %v736_v17, %s2395_s28  ;;  %s2249_s28 = scalar_lea.vmem %s2945_s29, 256 }
 0x3d5   : > { %p2250_p13 = scmp.ne.s32.totalorder %s2945_s29, %s2249_s28 }
 0x3d7   : > { %p2251_p7 = pnand %p2250_p13, %p3093_p3 }
 0x3d9   : > { %p2252_p9 = pneg %p2251_p7 }
 0x448   : > { %v789_v37 = vpop.xlane.xlu1 %788 }
 0x449   : > { %v790_v38 = vsub.f32 %v780_v27, %v789_v37  ;;  %v1866_v27 = vld [vmem:[#allocation15 + $0x8] sm:$0xff]  }
 0x44b   : > { %v791_v39 = vmul.f32 1.442695, %v790_v38  ;;  %v1868_v38 = vld [vmem:[#allocation18 + $0x8] sm:$0xff]  }
 0x44d   : > { %1871 = vpow2.f32 %v791_v39  ;;  %v1869_v39 = vld [vmem:[#allocation18 + $0x10] sm:$0xff]  }
 0x450   : > { %v903_v40 = vpop.xlane.xlu1 %902 }
 0x451   : > { %v904_v41 = vsub.f32 %v895_v32, %v903_v40  ;;  %v1870_v40 = vld [vmem:[#allocation18 + $0x18] sm:$0xff]  }
 0x453   : > { %v905_v42 = vmul.f32 1.442695, %v904_v41  ;;  %v1573_v41 = vld [vmem:[#allocation17] ss:$0 sm:$0xff] }
 0x454   : > { %v801_v43 = vpop.permute.xlu1 %800 }
 0x455   : > { %1873 = vpow2.f32 %v905_v42  ;;  %v807_v44 = vsel %vm805_vm3, %v801_v43, 0 }
 0x456   : > { %1622 = vmatpush3.bf16.msra.mxu0 %v807_v44 }
 0x457   : > { %v1872_v45 = vpop.eup %1871  ;;  %1633 = vmatprep.subr.bf16.mxu0 %v2391_v9 }
 0x458   : > { %v793_v46 = vsel %vm786_vm2, %v1872_v45, 0.0 }
 0x459   : > { %794 = vadd.xlane.f32.xlu0 %v793_v46 }
 0x45f   : > { %v1874_v47 = vpop.eup %1873 }
 0x460   : > { %v907_v48 = vsel %vm786_vm2, %v1874_v47, 0.0 }
 0x461   : > { %908 = vadd.xlane.f32.xlu1 %v907_v48 }
 0x472   : > { %916 = vrot.lane.b32.xlu1 %v852_v24, %s2393_s19  ;;  %s2943_s19 = scalar_lea.hbm %s3092_s20, %s1593_s17 }
 0x4e6   : > { %v795_v49 = vpop.xlane.xlu0 %794 }
 0x4e7   : > { %1875 = vrcp.f32 %v795_v49  ;;  %v1577_v49 = vld [vmem:[#allocation20] ss:$0 sm:$0xff] }
 0x4ee   : > { %v909_v50 = vpop.xlane.xlu1 %908 }
 0x4ef   : > { %1877 = vrcp.f32 %v909_v50 }
 0x4f1   : > { %v1876_v51 = vpop.eup %1875 }
 0x4f2   : > { %v797_v52 = vmul.f32 %v1876_v51, %v1872_v45  ;;  %v917_v53 = vpop.permute.xlu1 %916 }
 0x4f3   : > { %v922_v55 = vsel %vm805_vm3, %v917_v53, 0 }
 0x4f4   : > { %v799_v54 = vpack.c.bf16 %v797_v52, %v797_v52  ;;  %798 = vst.msk [vmem:[%s2905_s22] sm:$0xff] %vm786_vm2, %v797_v52 }
 0x4f6   : > { %1624 = vmatmul.mubr.msk.bf16.vlgmr.msra.gmra.mrb[0].mxu0 %vm786_vm2, %v799_v54 }
 0x4f7   : > { %1634 = vmatpush3.bf16.msra.mxu0 %v922_v55  ;;  %1635 = vmatprep.mubr.msk.bf16.mxu0 %vm2392_vm1, %v2391_v9 }
 0x4f8   : > { %1651 = vmatprep.subr.bf16.mxu0 %v2391_v9 }
 0x4f9   : > { %v1878_v56 = vpop.eup %1877 }
 0x4fa   : > { %v911_v57 = vmul.f32 %v1878_v56, %v1874_v47 }
 0x4fc   : > { %v914_v58 = vpack.c.bf16 %v911_v57, %v911_v57  ;;  %1562 = vst.msk [vmem:[%s2905_s22 + $0x8] sm:$0xff] %vm786_vm2, %v911_v57  ;;  %s2255_s22 = scalar_lea.vmem %s2254_s14, 512 }
 0x4fd   : > { %p2257_p8 = scmp.lt.s32.totalorder %s2255_s22, %s2249_s28 }
 0x4fe   : > { %1636 = vmatmul.mubr.msk.bf16.vlgmr.msra.gmra.mrb[4].mxu0 %vm786_vm2, %v914_v58 }
 0x4ff   : > { %1655 = vmatprep.mubr.msk.bf16.mxu0 %vm2392_vm1, %v2391_v9  ;;  %1652 = vmatpush3.bf16.msra.mxu0 %v1865_v26  ;;  %p2258_p0 = por %p2257_p8, %p2256_p4 }
 0x500   : > { %1653 = vmatprep.subr.bf16.mxu0 %v2391_v9 }
 0x501   : > { %p2259_p2 = pnand %p2258_p0, %p2252_p9 }
 0x503   : > { %1654 = vmatpush3.bf16.msra.mxu0 %v1866_v27 }
 0x504   : > { %1659 = vmatprep.subr.bf16.mxu0 %v2391_v9 }
 0x5c9   : > { %v843_v62 = vpop.f32.mrb[0].mxu0 }
 0x5ca   : > { %v849_v0 = vpack.c.bf16 %v843_v62, %v843_v62  ;;  %v1625_v1 = vpop.f32.mrb[1].mxu0 }
 0x5cb   : > { %v846_v2 = vpop.f32.mrb[2].mxu0 }
 0x5cc   : > { %851 = vst.msk [vmem:[#allocation2] sm:$0xf] %vm850_vm4, %v849_v0  ;;  %v1626_v3 = vpop.f32.mrb[3].mxu0 }
 0x5d1   : > { %v958_v4 = vpop.f32.mrb[4].mxu0 }
 0x5d2   : > { %v1592_v6 = vpack.c.bf16 %v958_v4, %v958_v4  ;;  %v1637_v7 = vpop.f32.mrb[5].mxu0 }
 0x5d3   : > { %v961_v8 = vpop.f32.mrb[6].mxu0 }
 0x5d4   : > { %968 = vrot.lane.b32.xlu1 %v1592_v6, %s2394_s0  ;;  %v1638_v10 = vpop.f32.mrb[7].mxu0 }
 0x646   : > { %v969_v11 = vpop.permute.xlu1 %968 }
 0x647   : > { %972 = vst.msk [vmem:[#allocation2] sm:$0xf] %vm971_vm5, %v969_v11 }
 0x64e   : > { %v973_v12 = vld [vmem:[#allocation2] sm:$0xf] }
 0x64f   : > { %1648 = vmatmul.mubr.msk.bf16.vlgmr.msra.gmra.mrb[12].mxu1 %vm1013_vm6, %v973_v12 }
 0x722   : > { %v1051_v14 = vpop.f32.mrb[12].mxu1 }
 0x723   : > { %v1052_v15 = vadd.f32 %v1565_v13, %v1051_v14  ;;  %v1649_v16 = vpop.f32.mrb[13].mxu1 }
 0x724   : > { %v1054_v17 = vpop.f32.mrb[14].mxu1 }
 0x725   : > { %v1650_v18 = vpop.f32.mrb[15].mxu1  ;;  %v1057_v19 = vadd.f32 %v1052_v15, %v2874_v5 }
 0x727   : > { %v1060_v20 = vsel %vm691_vm0, %v1057_v19, 0.0 }
 0x728   : > { %1061 = vadd.xlane.f32.xlu1 %v1060_v20 }
 0x7b5   : > { %v1062_v21 = vpop.xlane.xlu1 %1061 }
 0x7b6   : > { %v1064_v22 = vmul.f32 0.03125, %v1062_v21 }
 0x7b8   : > { %v1065_v23 = vsub.f32 %v1057_v19, %v1064_v22 }
 0x7ba   : > { %v1066_v24 = vmul.f32 %v1065_v23, %v1065_v23 }
 0x7bc   : > { %v1067_v25 = vsel %vm691_vm0, %v1066_v24, 0.0 }
 0x7bd   : > { %1068 = vadd.xlane.f32.xlu0 %v1067_v25 }
 0x84a   : > { %v1069_v28 = vpop.xlane.xlu0 %1068 }
 0x84b   : > { %v1070_v5 = vmul.f32 0.03125, %v1069_v28 }
 0x84d   : > { %v1071_v29 = vadd.f32 1e-05, %v1070_v5 }
 0x84f   : > { %1879 = vrsqrt.f32 %v1071_v29 }
 0x859   : > { %v1880_v30 = vpop.eup %1879 }
 0x85a   : > { %v1073_v32 = vmul.f32 %v1880_v30, %v1065_v23 }
 0x85c   : > { %v1080_v34 = vmul.f32 %v1571_v31, %v1073_v32 }
 0x85e   : > { %v1087_v35 = vadd.f32 %v1572_v33, %v1080_v34 }
 0x860   : > { %v1092_v37 = vpack.c.bf16 %v1087_v35, %v1087_v35 }
 0x862   : > { %1656 = vmatmul.mubr.msk.bf16.vlgmr.msra.gmra.mrb[8].mxu0 %vm691_vm0, %v1092_v37 }
 0x863   : > { %1660 = vmatpush3.bf16.msra.mxu0 %v1867_v36  ;;  %1667 = vmatprep.mubr.msk.bf16.mxu0 %vm2392_vm1, %v2391_v9 }
 0x864   : > { %1661 = vmatprep.subr.bf16.mxu0 %v2391_v9 }
 0x867   : > { %1662 = vmatpush3.bf16.msra.mxu0 %v1868_v38 }
 0x868   : > { %1663 = vmatprep.subr.bf16.mxu0 %v2391_v9 }
 0x86b   : > { %1664 = vmatpush3.bf16.msra.mxu0 %v1869_v39 }
 0x86c   : > { %1665 = vmatprep.subr.bf16.mxu0 %v2391_v9 }
 0x86f   : > { %1666 = vmatpush3.bf16.msra.mxu0 %v1870_v40 }
 0x935   : > { %v1149_v42 = vpop.f32.mrb[8].mxu0 }
 0x936   : > { %v1150_v43 = vadd.f32 %v1573_v41, %v1149_v42  ;;  %v1657_v44 = vpop.f32.mrb[9].mxu0 }
 0x937   : > { %v1152_v45 = vpop.f32.mrb[10].mxu0 }
 0x938   : > { %v1155_v46 = vmax.f32 %v1150_v43, 0.0  ;;  %v1658_v47 = vpop.f32.mrb[11].mxu0 }
 0x93a   : > { %v1164_v48 = vpack.c.bf16 %v1155_v46, %v1155_v46 }
 0x93c   : > { %1668 = vmatmul.mubr.msk.bf16.vlgmr.msra.gmra.mrb[12].mxu0 %vm1013_vm6, %v1164_v48 }
 0xa0f   : > { %v1233_v50 = vpop.f32.mrb[12].mxu0 }
 0xa10   : > { %v1234_v51 = vadd.f32 %v1577_v49, %v1233_v50  ;;  %v1669_v52 = vpop.f32.mrb[13].mxu0 }
 0xa11   : > { %v1236_v9 = vpop.f32.mrb[14].mxu0 }
 0xa12   : > { %v1670_v53 = vpop.f32.mrb[15].mxu0  ;;  %v1239_v54 = vadd.f32 %v1234_v51, %v1087_v35 }
 0xa14   : > { %v1242_v55 = vsel %vm691_vm0, %v1239_v54, 0.0 }
 0xa15   : > { %1243 = vadd.xlane.f32.xlu0 %v1242_v55 }
 0xaa2   : > { %v1244_v56 = vpop.xlane.xlu0 %1243 }
 0xaa3   : > { %v1245_v57 = vmul.f32 0.03125, %v1244_v56 }
 0xaa5   : > { %v1246_v58 = vsub.f32 %v1239_v54, %v1245_v57 }
 0xaa7   : > { %v1247_v59 = vmul.f32 %v1246_v58, %v1246_v58 }
 0xaa9   : > { %v1248_v60 = vsel %vm691_vm0, %v1247_v59, 0.0 }
 0xaaa   : > { %1249 = vadd.xlane.f32.xlu0 %v1248_v60 }
 0xaab   : > { %2262 = shalt.err (!%p2259_p2)
}
 0xaac   : > { %s2263_s17 = scalar_lea.hbm %s2943_s19, 256  ;;  %s2267_s24 = scalar_lea.hbm %s3092_s20, 512 }
 0xaad   : > { %p2264_p6 = scmp.ne.s32.totalorder %s2943_s19, %s2263_s17  ;;  %p2268_p1 = scmp.lt.u32.totalorder %s2943_s19, %s3092_s20 }
 0xaae   : > { %p2269_p11 = scmp.lt.u32.totalorder %s2267_s24, %s2263_s17  ;;  %p2271_p13 = scmp.lt.u32.totalorder %s2263_s17, %s2943_s19 }
 0xaaf   : > { %p2265_p5 = pnand %p2264_p6, %p3093_p3 }
 0xab0   : > { %p2270_p12 = por %p2269_p11, %p2268_p1 }
 0xab1   : > { %p2266_p10 = pneg %p2265_p5 }
 0xab2   : > { %p2272_p7 = por %p2271_p13, %p2270_p12 }
 0xab4   : > { %p2273_p9 = pnand %p2272_p7, %p2266_p10 }
 0xab6   : > { %2276 = shalt.err (!%p2273_p9)
}
 0xab7   : > { %s2397_s28 = smov 128   ;;  %s2398_s22 = smov 8   ;;  %v1583_v1 = vld [vmem:[#allocation21] ss:$0 sm:$0xff]  ;;  %v1584_v3 = vld [vmem:[#allocation23] ss:$0 sm:$0xff] }
 0xab8   : > { %s3094_s2 = scalar_lea.sflag [#allocation26], %s2840_s13  ;;  %s1587_s0 = sshll.u32 %s3079_s21, 7 }
 0xab9   : > { %1722 = dma.vmem_to_hbm [thread:$0]  (%p3093_p3), %s2945_s29, 256, %s2943_s19, %s3094_s2, %s2397_s28, %s2397_s28, %s2398_s22  }
 0xaba   : > { %s3095_s17 = sshll.u32 %s2840_s13, 3  ;;  %s3096_s4 = sld [smem:[#allocation44_spill]] }
 0xabb   : > { %s644_s18 = scalar_lea.vmem [#allocation24], %s3095_s17  ;;  %s1271_s19 = scalar_lea.sflag [#allocation5], %s2840_s13 }
 0xabc   : > { %s1289_s24 = sshll.u32 %s644_s18, 4  ;;  %s2399_s21 = smov [#allocation24]   ;;  %s2979_s24 = int_to_ptr.vmem [resolvable:$true] %s1289_s24 }
 0xabd   : > { %s2277_s28 = scalar_lea.vmem %s2979_s24, 128  ;;  %s2281_s22 = sshll.u32 %s2399_s21, 4  ;;  %s2282_s22 = int_to_ptr.vmem [resolvable:$false] %s2281_s22 }
 0xabe   : > { %p2278_p4 = scmp.ne.s32.totalorder %s2979_s24, %s2277_s28  ;;  %s2283_s2 = scalar_lea.vmem %s2282_s22, 256 }
 0xabf   : > { %p2284_p2 = scmp.lt.s32.totalorder %s2979_s24, %s2282_s22  ;;  %p2285_p6 = scmp.lt.s32.totalorder %s2283_s2, %s2277_s28 }
 0xac0   : > { %s2977_s29 = scalar_lea.hbm %s3096_s4, %s1587_s0  ;;  %p2279_p8 = pnand %p2278_p4, %p3093_p3 }
 0xac1   : > { %p2286_p5 = por %p2285_p6, %p2284_p2 }
 0xac2   : > { %p2280_p0 = pneg %p2279_p8 }
 0xac4   : > { %p2287_p10 = pnand %p2286_p5, %p2280_p0 }
 0xb37   : > { %v1250_v61 = vpop.xlane.xlu0 %1249 }
 0xb38   : > { %v1251_v62 = vmul.f32 0.03125, %v1250_v61 }
 0xb3a   : > { %v1252_v63 = vadd.f32 1e-05, %v1251_v62 }
 0xb3c   : > { %1881 = vrsqrt.f32 %v1252_v63 }
 0xb46   : > { %v1882_v0 = vpop.eup %1881 }
 0xb47   : > { %v1254_v2 = vmul.f32 %v1882_v0, %v1246_v58 }
 0xb49   : > { %v1261_v4 = vmul.f32 %v1583_v1, %v1254_v2 }
 0xb4b   : > { %v1268_v6 = vadd.f32 %v1584_v3, %v1261_v4 }
 0xb4d   : > { %1269 = vst.msk [vmem:[%s644_s18] sm:$0xff] %vm691_vm0, %v1268_v6 }
 0xb4e   : > { %2290 = shalt.err (!%p2287_p10)
}
 0xb4f   : > { %s2291_s3 = scalar_lea.hbm %s2977_s29, 128  ;;  %s2295_s17 = scalar_lea.hbm %s3096_s4, 256 }
 0xb50   : > { %p2292_p1 = scmp.ne.s32.totalorder %s2977_s29, %s2291_s3  ;;  %p2296_p13 = scmp.lt.u32.totalorder %s2977_s29, %s3096_s4 }
 0xb51   : > { %p2297_p7 = scmp.lt.u32.totalorder %s2295_s17, %s2291_s3  ;;  %p2299_p4 = scmp.lt.u32.totalorder %s2291_s3, %s2977_s29 }
 0xb52   : > { %p2293_p11 = pnand %p2292_p1, %p3093_p3 }
 0xb53   : > { %p2298_p9 = por %p2297_p7, %p2296_p13 }
 0xb54   : > { %p2294_p12 = pneg %p2293_p11 }
 0xb55   : > { %p2300_p8 = por %p2299_p4, %p2298_p9 }
 0xb57   : > { %p2301_p0 = pnand %p2300_p8, %p2294_p12 }
 0xb59   : > { %2304 = shalt.err (!%p2301_p0)
}
 0xb5a   : > { %1721 = dma.vmem_to_hbm [thread:$0]  (%p3093_p3), %s2979_s24, 128, %s2977_s29, %s1271_s19  }
 0xb5b PF: > { %s3097_s28 = sld [smem:[#allocation36_spill]]  ;;  %p3098_p2 = scmp.ne.s32.totalorder %s3074_s26, 0 }
 0xb5c   : > { %p3099_p6 = scmp.ge.s32.totalorder %s2371_s16, 2 }
 0xb5e   : > { %p1767_p5 = pnand %p3099_p6, %p3098_p2 }
 0xb61   : > { %s1317_s21 = sand.u32 1, %s3097_s28  }
 0xb62   : > { %s1318_s22 = scalar_lea.sflag [#allocation5], %s1317_s21 }
 0xb63   : > { %2350 = dma.done.wait (!%p1767_p5), %s1318_s22, 128  }
 0xb64   : > { %2352 = vsyncadd (!%p1767_p5), %s1318_s22, 4294967168  ;;  %s1327_s2 = scalar_lea.sflag [#allocation26], %s1317_s21 }
 0xb65   : > { %2354 = dma.done.wait (!%p1767_p5), %s1327_s2, 256  }
 0xb66   : > { %2356 = vsyncadd (!%p1767_p5), %s1327_s2, 4294967040  ;;  %p37_p3 = scmp.ge.s32.totalorder %s2764_s23, 4   ;;  %s3100_s29 = smov %s2363_s30 }
 0xb67   : > { %s3101_s30 = smov %s2367_s15  ;;  %s3102_s15 = smov %s2775_s25 }
 0xb68   : > { %s3103_s16 = smov %s2764_s23  ;;  %39 = sbr.rel (!%p37_p3) target bundleno = 21 (0x15), region = 183 }
 0xb6f   :  { %1332 = vsyncpa [#allocation4], 1 }
 0xb70   :  { %1334 = vsyncpa [#allocation4 + $0x1], 1 }
 0xb71   :  { %1335 = vsyncpa [#allocation7], 1 }
 0xb72   :  { %1336 = vsyncpa [#allocation10], 1 }
 0xb73   :  { %1337 = vsyncpa [#allocation13], 1 }
 0xb74   :  { %1338 = vsyncpa [#allocation16], 1 }
 0xb75   :  { %1339 = vsyncpa [#allocation19], 1 }
 0xb76   :  { %1340 = vsyncpa [#allocation22], 1 }
 0xb77   :  { %1341 = vsyncpa [#allocation5], 1 }
 0xb78   :  { %1343 = vsyncpa [#allocation5 + $0x1], 1 }
 0xb79   :  { %1344 = vsyncpa [#allocation26], 1 }
 0xb7a   :  { %1346 = vsyncpa [#allocation26 + $0x1], 1 }

</bundles_post_ra>
